<compile_context>
chip_gen: v7x
topology: tpu7x:2x2x1
jax: 0.10.0
libtpu: 0.0.40
codegen_flags: <defaults>
</compile_context>

<pallas_src>
import functools

import jax
import jax.numpy as jnp
from jax.experimental import pallas as pl
from jax.experimental.pallas import tpu as pltpu


CFG = dict(
    vocab=100, hidden=32, layers=2, heads=4, intermediate=64,
    max_pos=16, type_vocab=2, num_labels=2,
)


# ------------------------------ fused kernel ------------------------------

def _gelu(x):
    # TODO(synk): HF BERT uses erf-GELU; tanh approximation differs at ~1e-3.
    return 0.5 * x * (1.0 + jnp.tanh(0.7978845608028654 * (x + 0.044715 * x * x * x)))


def _layernorm(x, g, b, eps):
    mu = jnp.mean(x, axis=-1, keepdims=True)
    xc = x - mu
    var = jnp.mean(xc * xc, axis=-1, keepdims=True)
    return xc * jax.lax.rsqrt(var + eps) * g + b


def _bert_fused_kernel(
    emb_ref, bias_ref, emb_g_ref, emb_b_ref,
    wqkv_ref, bqkv_ref, wo_ref, bo_ref, ln1_g_ref, ln1_b_ref,
    w1_ref, b1_ref, w2_ref, b2_ref, ln2_g_ref, ln2_b_ref,
    cls_w_ref, cls_b_ref,
    logits_ref,
    *, num_layers, B, S, H, dh, eps):
    D = H * dh
    bf16 = jnp.bfloat16

    bias = bias_ref[...]                                   # (B, 1, S) additive key bias

    # Embedding layernorm — no-residual path; LN math in f32 (bf16 input DMA).
    h = _layernorm(emb_ref[...].astype(jnp.float32),
                   emb_g_ref[...], emb_b_ref[...], eps)    # (B*S, D) f32

    for l in range(num_layers):
        # ---- fused QKV projection: one MXU push with N = 3*D (scale folded in Q) ----
        qkv = (jnp.dot(h.astype(bf16), wqkv_ref[l],
                       preferred_element_type=jnp.float32)
               + bqkv_ref[l])                              # (B*S, 3D) f32

        # ---- attention: per head, batched over B with single-batch-dim einsums ----
        ctx_heads = []
        for hh in range(H):
            c0 = hh * dh
            qh = qkv[:, 0 * D + c0:0 * D + c0 + dh].reshape(B, S, dh)
            kh = qkv[:, 1 * D + c0:1 * D + c0 + dh].reshape(B, S, dh)
            vh = qkv[:, 2 * D + c0:2 * D + c0 + dh].reshape(B, S, dh)

            s = jnp.einsum('bqd,bkd->bqk',
                           qh.astype(bf16), kh.astype(bf16),
                           preferred_element_type=jnp.float32) + bias   # (B, S, S)
            m = jnp.max(s, axis=-1, keepdims=True)
            p = jnp.exp(s - m)
            p = p * pl.reciprocal(jnp.sum(p, axis=-1, keepdims=True), approx=True)
            ctx_h = jnp.einsum('bqk,bkd->bqd',
                               p.astype(bf16), vh.astype(bf16),
                               preferred_element_type=jnp.float32)      # (B, S, dh)
            ctx_heads.append(ctx_h.reshape(B * S, dh))
        ctx = jnp.concatenate(ctx_heads, axis=-1)          # (B*S, D) f32

        attn_out = (jnp.dot(ctx.astype(bf16), wo_ref[l],
                            preferred_element_type=jnp.float32) + bo_ref[l])
        h = _layernorm(attn_out + h, ln1_g_ref[l], ln1_b_ref[l], eps)

        # ---- feed-forward ----
        ff = _gelu(jnp.dot(h.astype(bf16), w1_ref[l],
                           preferred_element_type=jnp.float32) + b1_ref[l])
        ff = (jnp.dot(ff.astype(bf16), w2_ref[l],
                      preferred_element_type=jnp.float32) + b2_ref[l])
        h = _layernorm(ff + h, ln2_g_ref[l], ln2_b_ref[l], eps)

    # ---- classifier epilogue: CLS token rows (row b*S per batch), static slices ----
    cls_rows = jnp.concatenate([h[b * S:b * S + 1, :] for b in range(B)], axis=0)
    logits = (jnp.dot(cls_rows.astype(bf16), cls_w_ref[...],
                      preferred_element_type=jnp.float32) + cls_b_ref[...])
    logits_ref[...] = logits.astype(logits_ref.dtype)


# --------------------------- Model construction ---------------------------

def init_params(key, cfg):
    D, I = cfg["hidden"], cfg["intermediate"]

    def nrm(k, shape, std=0.02):
        return (std * jax.random.normal(k, shape)).astype(jnp.float32)

    keys = iter(jax.random.split(key, 64))
    params = {
        "word_emb": nrm(next(keys), (cfg["vocab"], D)),
        "pos_emb": nrm(next(keys), (cfg["max_pos"], D)),
        "type_emb": nrm(next(keys), (cfg["type_vocab"], D)),
        "emb_ln_g": jnp.ones((D,), jnp.float32),
        "emb_ln_b": jnp.zeros((D,), jnp.float32),
        "cls_w": nrm(next(keys), (D, cfg["num_labels"])),
        "cls_b": jnp.zeros((cfg["num_labels"],), jnp.float32),
        "layers": [],
    }
    for _ in range(cfg["layers"]):
        layer = {
            "wq": nrm(next(keys), (D, D)), "bq": jnp.zeros((D,), jnp.float32),
            "wk": nrm(next(keys), (D, D)), "bk": jnp.zeros((D,), jnp.float32),
            "wv": nrm(next(keys), (D, D)), "bv": jnp.zeros((D,), jnp.float32),
            "wo": nrm(next(keys), (D, D)), "bo": jnp.zeros((D,), jnp.float32),
            "ln1_g": jnp.ones((D,), jnp.float32), "ln1_b": jnp.zeros((D,), jnp.float32),
            "w1": nrm(next(keys), (D, I)), "b1": jnp.zeros((I,), jnp.float32),
            "w2": nrm(next(keys), (I, D)), "b2": jnp.zeros((D,), jnp.float32),
            "ln2_g": jnp.ones((D,), jnp.float32), "ln2_b": jnp.zeros((D,), jnp.float32),
        }
        params["layers"].append(layer)
    return params


def pack_params(params, cfg):
    """Fuse QKV weights (scale folded into Q), stack layers, cast matmul weights to bf16."""
    layers = params["layers"]
    D = cfg["hidden"]
    dh = D // cfg["heads"]
    scale = 1.0 / (dh ** 0.5)

    def row(x):  # (N,) -> (1, N)
        return x[None, :]

    def bf16(x):
        return x.astype(jnp.bfloat16)

    packed = dict(
        word_emb=params["word_emb"],
        pos_emb=params["pos_emb"],
        type_emb=params["type_emb"],
        emb_ln_g=row(params["emb_ln_g"]),
        emb_ln_b=row(params["emb_ln_b"]),
        # Columns are [Q | K | V], head-major within each; 1/sqrt(dh) folded into Q.
        wqkv=bf16(jnp.stack([jnp.concatenate([lp["wq"] * scale, lp["wk"], lp["wv"]],
                                             axis=1) for lp in layers])),     # (L, D, 3D)
        bqkv=jnp.stack([row(jnp.concatenate([lp["bq"] * scale, lp["bk"], lp["bv"]]))
                        for lp in layers]),                                    # (L, 1, 3D)
        wo=bf16(jnp.stack([lp["wo"] for lp in layers])),                       # (L, D, D)
        bo=jnp.stack([row(lp["bo"]) for lp in layers]),                        # (L, 1, D)
        ln1_g=jnp.stack([row(lp["ln1_g"]) for lp in layers]),
        ln1_b=jnp.stack([row(lp["ln1_b"]) for lp in layers]),
        w1=bf16(jnp.stack([lp["w1"] for lp in layers])),                       # (L, D, I)
        b1=jnp.stack([row(lp["b1"]) for lp in layers]),                        # (L, 1, I)
        w2=bf16(jnp.stack([lp["w2"] for lp in layers])),                       # (L, I, D)
        b2=jnp.stack([row(lp["b2"]) for lp in layers]),
        ln2_g=jnp.stack([row(lp["ln2_g"]) for lp in layers]),
        ln2_b=jnp.stack([row(lp["ln2_b"]) for lp in layers]),
        cls_w=bf16(params["cls_w"]),
        cls_b=row(params["cls_b"]),
    )
    return packed


def _full_spec(shape):
    n = len(shape)
    return pl.BlockSpec(shape, lambda *_: (0,) * n)


def bert_sentiment_forward(packed, input_ids, attention_mask, token_type_ids=None):
    B, S = input_ids.shape
    D = CFG["hidden"]
    H = CFG["heads"]
    dh = D // H
    L = packed["wqkv"].shape[0]
    num_labels = packed["cls_w"].shape[-1]
    if token_type_ids is None:
        token_type_ids = jnp.zeros_like(input_ids)

    # Embedding lookups are data-dependent gathers — left in XLA as glue.
    emb = (jnp.take(packed["word_emb"], input_ids, axis=0)
           + packed["pos_emb"][jnp.arange(S)][None, :, :]
           + jnp.take(packed["type_emb"], token_type_ids, axis=0))
    emb = emb.reshape(B * S, D).astype(jnp.bfloat16)       # bf16 halves input DMA bytes

    # Tiny (B, 1, S) additive key-mask bias; broadcast over heads/queries in-kernel.
    mask_bias = ((1.0 - attention_mask.astype(jnp.float32)) * -1e9).reshape(B, 1, S)

    args = (
        emb, mask_bias, packed["emb_ln_g"], packed["emb_ln_b"],
        packed["wqkv"], packed["bqkv"], packed["wo"], packed["bo"],
        packed["ln1_g"], packed["ln1_b"],
        packed["w1"], packed["b1"], packed["w2"], packed["b2"],
        packed["ln2_g"], packed["ln2_b"],
        packed["cls_w"], packed["cls_b"],
    )

    kernel = functools.partial(
        _bert_fused_kernel, num_layers=L, B=B, S=S, H=H, dh=dh, eps=1e-12)

    # Single fused pallas_call: everything stays VMEM/vreg-resident (no scratch).
    logits = pl.pallas_call(
        kernel,
        out_shape=jax.ShapeDtypeStruct((B, num_labels), jnp.float32),
        grid=(1,),
        in_specs=[_full_spec(a.shape) for a in args],
        out_specs=pl.BlockSpec((B, num_labels), lambda i: (0, 0)),
        compiler_params=pltpu.CompilerParams(
            dimension_semantics=("arbitrary",)),
    )(*args)
    return logits


# ----------------------------------- main ----------------------------------

if __name__ == "__main__":
    key = jax.random.PRNGKey(0)
    pkey, ikey = jax.random.split(key)

    B, S = 2, 8
    params = init_params(pkey, CFG)
    packed = pack_params(params, CFG)

    input_ids = jax.random.randint(ikey, (B, S), 0, CFG["vocab"], dtype=jnp.int32)
    attention_mask = jnp.ones((B, S), jnp.int32).at[1, 6:].set(0)  # pad tail of row 1
    token_type_ids = jnp.zeros((B, S), jnp.int32)

    fwd = jax.jit(bert_sentiment_forward)
    logits = fwd(packed, input_ids, attention_mask, token_type_ids)
    jax.block_until_ready(logits)

    assert logits.shape == (B, CFG["num_labels"])
    assert bool(jnp.all(jnp.isfinite(logits)))
    print("KERNEL_OK")
</pallas_src>

<mosaic_0001>
module attributes {stable_mosaic.version = 11 : i64} {
  func.func @_bert_fused_kernel(%arg0: i32, %arg1: memref<16x32xbf16, #tpu.memory_space<vmem>>, %arg2: memref<2x1x8xf32, #tpu.memory_space<vmem>>, %arg3: memref<1x32xf32, #tpu.memory_space<vmem>>, %arg4: memref<1x32xf32, #tpu.memory_space<vmem>>, %arg5: memref<2x32x96xbf16, #tpu.memory_space<vmem>>, %arg6: memref<2x1x96xf32, #tpu.memory_space<vmem>>, %arg7: memref<2x32x32xbf16, #tpu.memory_space<vmem>>, %arg8: memref<2x1x32xf32, #tpu.memory_space<vmem>>, %arg9: memref<2x1x32xf32, #tpu.memory_space<vmem>>, %arg10: memref<2x1x32xf32, #tpu.memory_space<vmem>>, %arg11: memref<2x32x64xbf16, #tpu.memory_space<vmem>>, %arg12: memref<2x1x64xf32, #tpu.memory_space<vmem>>, %arg13: memref<2x64x32xbf16, #tpu.memory_space<vmem>>, %arg14: memref<2x1x32xf32, #tpu.memory_space<vmem>>, %arg15: memref<2x1x32xf32, #tpu.memory_space<vmem>>, %arg16: memref<2x1x32xf32, #tpu.memory_space<vmem>>, %arg17: memref<32x2xbf16, #tpu.memory_space<vmem>>, %arg18: memref<1x2xf32, #tpu.memory_space<vmem>>, %arg19: memref<2x2xf32, #tpu.memory_space<vmem>>) attributes {dimension_semantics = [#tpu.dimension_semantics<arbitrary>], iteration_bounds = array<i64: 1>, scalar_prefetch = 0 : i64, scratch_operands = 0 : i64, tpu.core_type = #tpu.core_type<tc>, window_params = [{pipeline_mode = #tpu.pipeline_mode<synchronous>, transform_indices = @transform_0, window_bounds = array<i64: 16, 32>}, {pipeline_mode = #tpu.pipeline_mode<synchronous>, transform_indices = @transform_1, window_bounds = array<i64: 2, 1, 8>}, {pipeline_mode = #tpu.pipeline_mode<synchronous>, transform_indices = @transform_2, window_bounds = array<i64: 1, 32>}, {pipeline_mode = #tpu.pipeline_mode<synchronous>, transform_indices = @transform_3, window_bounds = array<i64: 1, 32>}, {pipeline_mode = #tpu.pipeline_mode<synchronous>, transform_indices = @transform_4, window_bounds = array<i64: 2, 32, 96>}, {pipeline_mode = #tpu.pipeline_mode<synchronous>, transform_indices = @transform_5, window_bounds = array<i64: 2, 1, 96>}, {pipeline_mode = #tpu.pipeline_mode<synchronous>, transform_indices = @transform_6, window_bounds = array<i64: 2, 32, 32>}, {pipeline_mode = #tpu.pipeline_mode<synchronous>, transform_indices = @transform_7, window_bounds = array<i64: 2, 1, 32>}, {pipeline_mode = #tpu.pipeline_mode<synchronous>, transform_indices = @transform_8, window_bounds = array<i64: 2, 1, 32>}, {pipeline_mode = #tpu.pipeline_mode<synchronous>, transform_indices = @transform_9, window_bounds = array<i64: 2, 1, 32>}, {pipeline_mode = #tpu.pipeline_mode<synchronous>, transform_indices = @transform_10, window_bounds = array<i64: 2, 32, 64>}, {pipeline_mode = #tpu.pipeline_mode<synchronous>, transform_indices = @transform_11, window_bounds = array<i64: 2, 1, 64>}, {pipeline_mode = #tpu.pipeline_mode<synchronous>, transform_indices = @transform_12, window_bounds = array<i64: 2, 64, 32>}, {pipeline_mode = #tpu.pipeline_mode<synchronous>, transform_indices = @transform_13, window_bounds = array<i64: 2, 1, 32>}, {pipeline_mode = #tpu.pipeline_mode<synchronous>, transform_indices = @transform_14, window_bounds = array<i64: 2, 1, 32>}, {pipeline_mode = #tpu.pipeline_mode<synchronous>, transform_indices = @transform_15, window_bounds = array<i64: 2, 1, 32>}, {pipeline_mode = #tpu.pipeline_mode<synchronous>, transform_indices = @transform_16, window_bounds = array<i64: 32, 2>}, {pipeline_mode = #tpu.pipeline_mode<synchronous>, transform_indices = @transform_17, window_bounds = array<i64: 1, 2>}, {pipeline_mode = #tpu.pipeline_mode<synchronous>, transform_indices = @transform_18, window_bounds = array<i64: 2, 2>}]} {
    %c0 = arith.constant 0 : index
    %c0_0 = arith.constant 0 : index
    %c0_1 = arith.constant 0 : index
    %0 = vector.load %arg2[%c0, %c0_0, %c0_1] : memref<2x1x8xf32, #tpu.memory_space<vmem>>, vector<2x1x8xf32>
    %c0_2 = arith.constant 0 : index
    %c0_3 = arith.constant 0 : index
    %1 = vector.load %arg1[%c0_2, %c0_3] : memref<16x32xbf16, #tpu.memory_space<vmem>>, vector<16x32xbf16>
    %2 = arith.extf %1 : vector<16x32xbf16> to vector<16x32xf32>
    %c0_4 = arith.constant 0 : index
    %c0_5 = arith.constant 0 : index
    %3 = vector.load %arg3[%c0_4, %c0_5] : memref<1x32xf32, #tpu.memory_space<vmem>>, vector<1x32xf32>
    %c0_6 = arith.constant 0 : index
    %c0_7 = arith.constant 0 : index
    %4 = vector.load %arg4[%c0_6, %c0_7] : memref<1x32xf32, #tpu.memory_space<vmem>>, vector<1x32xf32>
    %cst = arith.constant dense<0.000000e+00> : vector<16xf32>
    %5 = vector.multi_reduction <add>, %2, %cst [1] : vector<16x32xf32> to vector<16xf32>
    %6 = vector.shape_cast %5 : vector<16xf32> to vector<16x1xf32>
    %cst_8 = arith.constant 3.200000e+01 : f32
    %7 = vector.broadcast %cst_8 : f32 to vector<16x1xf32>
    %8 = arith.divf %6, %7 : vector<16x1xf32>
    %9 = vector.broadcast %8 : vector<16x1xf32> to vector<16x32xf32>
    %10 = arith.subf %2, %9 : vector<16x32xf32>
    %11 = arith.mulf %10, %10 : vector<16x32xf32>
    %cst_9 = arith.constant dense<0.000000e+00> : vector<16xf32>
    %12 = vector.multi_reduction <add>, %11, %cst_9 [1] : vector<16x32xf32> to vector<16xf32>
    %13 = vector.shape_cast %12 : vector<16xf32> to vector<16x1xf32>
    %cst_10 = arith.constant 3.200000e+01 : f32
    %14 = vector.broadcast %cst_10 : f32 to vector<16x1xf32>
    %15 = arith.divf %13, %14 : vector<16x1xf32>
    %cst_11 = arith.constant 9.99999996E-13 : f32
    %16 = vector.broadcast %cst_11 : f32 to vector<16x1xf32>
    %17 = arith.addf %15, %16 : vector<16x1xf32>
    %18 = math.rsqrt %17 : vector<16x1xf32>
    %19 = vector.broadcast %18 : vector<16x1xf32> to vector<16x32xf32>
    %20 = arith.mulf %10, %19 : vector<16x32xf32>
    %21 = vector.broadcast %3 : vector<1x32xf32> to vector<16x32xf32>
    %22 = arith.mulf %20, %21 : vector<16x32xf32>
    %23 = vector.broadcast %4 : vector<1x32xf32> to vector<16x32xf32>
    %24 = arith.addf %22, %23 : vector<16x32xf32>
    %25 = arith.truncf %24 : vector<16x32xf32> to vector<16x32xbf16>
    %c0_12 = arith.constant 0 : index
    %c0_13 = arith.constant 0 : index
    %c0_14 = arith.constant 0 : index
    %26 = vector.load %arg5[%c0_12, %c0_13, %c0_14] : memref<2x32x96xbf16, #tpu.memory_space<vmem>>, vector<1x32x96xbf16>
    %27 = vector.shape_cast %26 : vector<1x32x96xbf16> to vector<32x96xbf16>
    %cst_15 = arith.constant dense<0.000000e+00> : vector<16x96xf32>
    %28 = tpu.matmul %25, %27, %cst_15 {dimension_numbers = #tpu.dot_dimension_numbers<[1], [0], [0], [1], [0, 0, 1, 1], [], []>} : vector<16x32xbf16>, vector<32x96xbf16>, vector<16x96xf32> -> vector<16x96xf32>
    %c0_16 = arith.constant 0 : index
    %c0_17 = arith.constant 0 : index
    %c0_18 = arith.constant 0 : index
    %29 = vector.load %arg6[%c0_16, %c0_17, %c0_18] : memref<2x1x96xf32, #tpu.memory_space<vmem>>, vector<1x1x96xf32>
    %30 = vector.shape_cast %29 : vector<1x1x96xf32> to vector<1x96xf32>
    %31 = vector.broadcast %30 : vector<1x96xf32> to vector<16x96xf32>
    %32 = arith.addf %28, %31 : vector<16x96xf32>
    %33 = vector.extract_strided_slice %32 {offsets = [0, 0], sizes = [16, 8], strides = [1, 1]} : vector<16x96xf32> to vector<16x8xf32>
    %34 = vector.shape_cast %33 : vector<16x8xf32> to vector<2x8x8xf32>
    %35 = vector.extract_strided_slice %32 {offsets = [0, 32], sizes = [16, 8], strides = [1, 1]} : vector<16x96xf32> to vector<16x8xf32>
    %36 = vector.shape_cast %35 : vector<16x8xf32> to vector<2x8x8xf32>
    %37 = vector.extract_strided_slice %32 {offsets = [0, 64], sizes = [16, 8], strides = [1, 1]} : vector<16x96xf32> to vector<16x8xf32>
    %38 = vector.shape_cast %37 : vector<16x8xf32> to vector<2x8x8xf32>
    %39 = arith.truncf %34 : vector<2x8x8xf32> to vector<2x8x8xbf16>
    %40 = arith.truncf %36 : vector<2x8x8xf32> to vector<2x8x8xbf16>
    "tpu.trace_start"() <{level = 10 : i32, message = "bqd,bkd->bqk"}> : () -> ()
    %cst_19 = arith.constant dense<0.000000e+00> : vector<2x8x8xf32>
    %41 = tpu.matmul %39, %40, %cst_19 {dimension_numbers = #tpu.dot_dimension_numbers<[2], [2], [1], [1], [0, 0, 0, 1, 1, 1], [0], [0]>} : vector<2x8x8xbf16>, vector<2x8x8xbf16>, vector<2x8x8xf32> -> vector<2x8x8xf32>
    "tpu.trace_stop"() : () -> ()
    %42 = vector.broadcast %0 : vector<2x1x8xf32> to vector<2x8x8xf32>
    %43 = arith.addf %41, %42 : vector<2x8x8xf32>
    %cst_20 = arith.constant dense<0xFF800000> : vector<2x8xf32>
    %44 = vector.multi_reduction <maximumf>, %43, %cst_20 [2] : vector<2x8x8xf32> to vector<2x8xf32>
    %45 = vector.shape_cast %44 : vector<2x8xf32> to vector<2x8x1xf32>
    %46 = vector.broadcast %45 : vector<2x8x1xf32> to vector<2x8x8xf32>
    %47 = arith.subf %43, %46 : vector<2x8x8xf32>
    %48 = math.exp %47 : vector<2x8x8xf32>
    %cst_21 = arith.constant dense<0.000000e+00> : vector<2x8xf32>
    %49 = vector.multi_reduction <add>, %48, %cst_21 [2] : vector<2x8x8xf32> to vector<2x8xf32>
    %50 = vector.shape_cast %49 : vector<2x8xf32> to vector<2x8x1xf32>
    %51 = tpu.reciprocal %50 {approx = true} : vector<2x8x1xf32> -> vector<2x8x1xf32>
    %52 = vector.broadcast %51 : vector<2x8x1xf32> to vector<2x8x8xf32>
    %53 = arith.mulf %48, %52 : vector<2x8x8xf32>
    %54 = arith.truncf %53 : vector<2x8x8xf32> to vector<2x8x8xbf16>
    %55 = arith.truncf %38 : vector<2x8x8xf32> to vector<2x8x8xbf16>
    "tpu.trace_start"() <{level = 10 : i32, message = "bqk,bkd->bqd"}> : () -> ()
    %cst_22 = arith.constant dense<0.000000e+00> : vector<2x8x8xf32>
    %56 = tpu.matmul %54, %55, %cst_22 {dimension_numbers = #tpu.dot_dimension_numbers<[2], [1], [1], [2], [0, 0, 0, 1, 1, 2], [0], [0]>} : vector<2x8x8xbf16>, vector<2x8x8xbf16>, vector<2x8x8xf32> -> vector<2x8x8xf32>
    "tpu.trace_stop"() : () -> ()
    %57 = vector.shape_cast %56 : vector<2x8x8xf32> to vector<16x8xf32>
    %58 = vector.extract_strided_slice %32 {offsets = [0, 8], sizes = [16, 8], strides = [1, 1]} : vector<16x96xf32> to vector<16x8xf32>
    %59 = vector.shape_cast %58 : vector<16x8xf32> to vector<2x8x8xf32>
    %60 = vector.extract_strided_slice %32 {offsets = [0, 40], sizes = [16, 8], strides = [1, 1]} : vector<16x96xf32> to vector<16x8xf32>
    %61 = vector.shape_cast %60 : vector<16x8xf32> to vector<2x8x8xf32>
    %62 = vector.extract_strided_slice %32 {offsets = [0, 72], sizes = [16, 8], strides = [1, 1]} : vector<16x96xf32> to vector<16x8xf32>
    %63 = vector.shape_cast %62 : vector<16x8xf32> to vector<2x8x8xf32>
    %64 = arith.truncf %59 : vector<2x8x8xf32> to vector<2x8x8xbf16>
    %65 = arith.truncf %61 : vector<2x8x8xf32> to vector<2x8x8xbf16>
    "tpu.trace_start"() <{level = 10 : i32, message = "bqd,bkd->bqk"}> : () -> ()
    %cst_23 = arith.constant dense<0.000000e+00> : vector<2x8x8xf32>
    %66 = tpu.matmul %64, %65, %cst_23 {dimension_numbers = #tpu.dot_dimension_numbers<[2], [2], [1], [1], [0, 0, 0, 1, 1, 1], [0], [0]>} : vector<2x8x8xbf16>, vector<2x8x8xbf16>, vector<2x8x8xf32> -> vector<2x8x8xf32>
    "tpu.trace_stop"() : () -> ()
    %67 = vector.broadcast %0 : vector<2x1x8xf32> to vector<2x8x8xf32>
    %68 = arith.addf %66, %67 : vector<2x8x8xf32>
    %cst_24 = arith.constant dense<0xFF800000> : vector<2x8xf32>
    %69 = vector.multi_reduction <maximumf>, %68, %cst_24 [2] : vector<2x8x8xf32> to vector<2x8xf32>
    %70 = vector.shape_cast %69 : vector<2x8xf32> to vector<2x8x1xf32>
    %71 = vector.broadcast %70 : vector<2x8x1xf32> to vector<2x8x8xf32>
    %72 = arith.subf %68, %71 : vector<2x8x8xf32>
    %73 = math.exp %72 : vector<2x8x8xf32>
    %cst_25 = arith.constant dense<0.000000e+00> : vector<2x8xf32>
    %74 = vector.multi_reduction <add>, %73, %cst_25 [2] : vector<2x8x8xf32> to vector<2x8xf32>
    %75 = vector.shape_cast %74 : vector<2x8xf32> to vector<2x8x1xf32>
    %76 = tpu.reciprocal %75 {approx = true} : vector<2x8x1xf32> -> vector<2x8x1xf32>
    %77 = vector.broadcast %76 : vector<2x8x1xf32> to vector<2x8x8xf32>
    %78 = arith.mulf %73, %77 : vector<2x8x8xf32>
    %79 = arith.truncf %78 : vector<2x8x8xf32> to vector<2x8x8xbf16>
    %80 = arith.truncf %63 : vector<2x8x8xf32> to vector<2x8x8xbf16>
    "tpu.trace_start"() <{level = 10 : i32, message = "bqk,bkd->bqd"}> : () -> ()
    %cst_26 = arith.constant dense<0.000000e+00> : vector<2x8x8xf32>
    %81 = tpu.matmul %79, %80, %cst_26 {dimension_numbers = #tpu.dot_dimension_numbers<[2], [1], [1], [2], [0, 0, 0, 1, 1, 2], [0], [0]>} : vector<2x8x8xbf16>, vector<2x8x8xbf16>, vector<2x8x8xf32> -> vector<2x8x8xf32>
    "tpu.trace_stop"() : () -> ()
    %82 = vector.shape_cast %81 : vector<2x8x8xf32> to vector<16x8xf32>
    %83 = vector.extract_strided_slice %32 {offsets = [0, 16], sizes = [16, 8], strides = [1, 1]} : vector<16x96xf32> to vector<16x8xf32>
    %84 = vector.shape_cast %83 : vector<16x8xf32> to vector<2x8x8xf32>
    %85 = vector.extract_strided_slice %32 {offsets = [0, 48], sizes = [16, 8], strides = [1, 1]} : vector<16x96xf32> to vector<16x8xf32>
    %86 = vector.shape_cast %85 : vector<16x8xf32> to vector<2x8x8xf32>
    %87 = vector.extract_strided_slice %32 {offsets = [0, 80], sizes = [16, 8], strides = [1, 1]} : vector<16x96xf32> to vector<16x8xf32>
    %88 = vector.shape_cast %87 : vector<16x8xf32> to vector<2x8x8xf32>
    %89 = arith.truncf %84 : vector<2x8x8xf32> to vector<2x8x8xbf16>
    %90 = arith.truncf %86 : vector<2x8x8xf32> to vector<2x8x8xbf16>
    "tpu.trace_start"() <{level = 10 : i32, message = "bqd,bkd->bqk"}> : () -> ()
    %cst_27 = arith.constant dense<0.000000e+00> : vector<2x8x8xf32>
    %91 = tpu.matmul %89, %90, %cst_27 {dimension_numbers = #tpu.dot_dimension_numbers<[2], [2], [1], [1], [0, 0, 0, 1, 1, 1], [0], [0]>} : vector<2x8x8xbf16>, vector<2x8x8xbf16>, vector<2x8x8xf32> -> vector<2x8x8xf32>
    "tpu.trace_stop"() : () -> ()
    %92 = vector.broadcast %0 : vector<2x1x8xf32> to vector<2x8x8xf32>
    %93 = arith.addf %91, %92 : vector<2x8x8xf32>
    %cst_28 = arith.constant dense<0xFF800000> : vector<2x8xf32>
    %94 = vector.multi_reduction <maximumf>, %93, %cst_28 [2] : vector<2x8x8xf32> to vector<2x8xf32>
    %95 = vector.shape_cast %94 : vector<2x8xf32> to vector<2x8x1xf32>
    %96 = vector.broadcast %95 : vector<2x8x1xf32> to vector<2x8x8xf32>
    %97 = arith.subf %93, %96 : vector<2x8x8xf32>
    %98 = math.exp %97 : vector<2x8x8xf32>
    %cst_29 = arith.constant dense<0.000000e+00> : vector<2x8xf32>
    %99 = vector.multi_reduction <add>, %98, %cst_29 [2] : vector<2x8x8xf32> to vector<2x8xf32>
    %100 = vector.shape_cast %99 : vector<2x8xf32> to vector<2x8x1xf32>
    %101 = tpu.reciprocal %100 {approx = true} : vector<2x8x1xf32> -> vector<2x8x1xf32>
    %102 = vector.broadcast %101 : vector<2x8x1xf32> to vector<2x8x8xf32>
    %103 = arith.mulf %98, %102 : vector<2x8x8xf32>
    %104 = arith.truncf %103 : vector<2x8x8xf32> to vector<2x8x8xbf16>
    %105 = arith.truncf %88 : vector<2x8x8xf32> to vector<2x8x8xbf16>
    "tpu.trace_start"() <{level = 10 : i32, message = "bqk,bkd->bqd"}> : () -> ()
    %cst_30 = arith.constant dense<0.000000e+00> : vector<2x8x8xf32>
    %106 = tpu.matmul %104, %105, %cst_30 {dimension_numbers = #tpu.dot_dimension_numbers<[2], [1], [1], [2], [0, 0, 0, 1, 1, 2], [0], [0]>} : vector<2x8x8xbf16>, vector<2x8x8xbf16>, vector<2x8x8xf32> -> vector<2x8x8xf32>
    "tpu.trace_stop"() : () -> ()
    %107 = vector.shape_cast %106 : vector<2x8x8xf32> to vector<16x8xf32>
    %108 = vector.extract_strided_slice %32 {offsets = [0, 24], sizes = [16, 8], strides = [1, 1]} : vector<16x96xf32> to vector<16x8xf32>
    %109 = vector.shape_cast %108 : vector<16x8xf32> to vector<2x8x8xf32>
    %110 = vector.extract_strided_slice %32 {offsets = [0, 56], sizes = [16, 8], strides = [1, 1]} : vector<16x96xf32> to vector<16x8xf32>
    %111 = vector.shape_cast %110 : vector<16x8xf32> to vector<2x8x8xf32>
    %112 = vector.extract_strided_slice %32 {offsets = [0, 88], sizes = [16, 8], strides = [1, 1]} : vector<16x96xf32> to vector<16x8xf32>
    %113 = vector.shape_cast %112 : vector<16x8xf32> to vector<2x8x8xf32>
    %114 = arith.truncf %109 : vector<2x8x8xf32> to vector<2x8x8xbf16>
    %115 = arith.truncf %111 : vector<2x8x8xf32> to vector<2x8x8xbf16>
    "tpu.trace_start"() <{level = 10 : i32, message = "bqd,bkd->bqk"}> : () -> ()
    %cst_31 = arith.constant dense<0.000000e+00> : vector<2x8x8xf32>
    %116 = tpu.matmul %114, %115, %cst_31 {dimension_numbers = #tpu.dot_dimension_numbers<[2], [2], [1], [1], [0, 0, 0, 1, 1, 1], [0], [0]>} : vector<2x8x8xbf16>, vector<2x8x8xbf16>, vector<2x8x8xf32> -> vector<2x8x8xf32>
    "tpu.trace_stop"() : () -> ()
    %117 = vector.broadcast %0 : vector<2x1x8xf32> to vector<2x8x8xf32>
    %118 = arith.addf %116, %117 : vector<2x8x8xf32>
    %cst_32 = arith.constant dense<0xFF800000> : vector<2x8xf32>
    %119 = vector.multi_reduction <maximumf>, %118, %cst_32 [2] : vector<2x8x8xf32> to vector<2x8xf32>
    %120 = vector.shape_cast %119 : vector<2x8xf32> to vector<2x8x1xf32>
    %121 = vector.broadcast %120 : vector<2x8x1xf32> to vector<2x8x8xf32>
    %122 = arith.subf %118, %121 : vector<2x8x8xf32>
    %123 = math.exp %122 : vector<2x8x8xf32>
    %cst_33 = arith.constant dense<0.000000e+00> : vector<2x8xf32>
    %124 = vector.multi_reduction <add>, %123, %cst_33 [2] : vector<2x8x8xf32> to vector<2x8xf32>
    %125 = vector.shape_cast %124 : vector<2x8xf32> to vector<2x8x1xf32>
    %126 = tpu.reciprocal %125 {approx = true} : vector<2x8x1xf32> -> vector<2x8x1xf32>
    %127 = vector.broadcast %126 : vector<2x8x1xf32> to vector<2x8x8xf32>
    %128 = arith.mulf %123, %127 : vector<2x8x8xf32>
    %129 = arith.truncf %128 : vector<2x8x8xf32> to vector<2x8x8xbf16>
    %130 = arith.truncf %113 : vector<2x8x8xf32> to vector<2x8x8xbf16>
    "tpu.trace_start"() <{level = 10 : i32, message = "bqk,bkd->bqd"}> : () -> ()
    %cst_34 = arith.constant dense<0.000000e+00> : vector<2x8x8xf32>
    %131 = tpu.matmul %129, %130, %cst_34 {dimension_numbers = #tpu.dot_dimension_numbers<[2], [1], [1], [2], [0, 0, 0, 1, 1, 2], [0], [0]>} : vector<2x8x8xbf16>, vector<2x8x8xbf16>, vector<2x8x8xf32> -> vector<2x8x8xf32>
    "tpu.trace_stop"() : () -> ()
    %132 = vector.shape_cast %131 : vector<2x8x8xf32> to vector<16x8xf32>
    %133 = tpu.concatenate %57, %82, %107, %132 in 1 : vector<16x8xf32>, vector<16x8xf32>, vector<16x8xf32>, vector<16x8xf32> -> vector<16x32xf32>
    %134 = arith.truncf %133 : vector<16x32xf32> to vector<16x32xbf16>
    %c0_35 = arith.constant 0 : index
    %c0_36 = arith.constant 0 : index
    %c0_37 = arith.constant 0 : index
    %135 = vector.load %arg7[%c0_35, %c0_36, %c0_37] : memref<2x32x32xbf16, #tpu.memory_space<vmem>>, vector<1x32x32xbf16>
    %136 = vector.shape_cast %135 : vector<1x32x32xbf16> to vector<32x32xbf16>
    %cst_38 = arith.constant dense<0.000000e+00> : vector<16x32xf32>
    %137 = tpu.matmul %134, %136, %cst_38 {dimension_numbers = #tpu.dot_dimension_numbers<[1], [0], [0], [1], [0, 0, 1, 1], [], []>} : vector<16x32xbf16>, vector<32x32xbf16>, vector<16x32xf32> -> vector<16x32xf32>
    %c0_39 = arith.constant 0 : index
    %c0_40 = arith.constant 0 : index
    %c0_41 = arith.constant 0 : index
    %138 = vector.load %arg8[%c0_39, %c0_40, %c0_41] : memref<2x1x32xf32, #tpu.memory_space<vmem>>, vector<1x1x32xf32>
    %139 = vector.shape_cast %138 : vector<1x1x32xf32> to vector<1x32xf32>
    %140 = vector.broadcast %139 : vector<1x32xf32> to vector<16x32xf32>
    %141 = arith.addf %137, %140 : vector<16x32xf32>
    %142 = arith.addf %141, %24 : vector<16x32xf32>
    %c0_42 = arith.constant 0 : index
    %c0_43 = arith.constant 0 : index
    %c0_44 = arith.constant 0 : index
    %143 = vector.load %arg9[%c0_42, %c0_43, %c0_44] : memref<2x1x32xf32, #tpu.memory_space<vmem>>, vector<1x1x32xf32>
    %144 = vector.shape_cast %143 : vector<1x1x32xf32> to vector<1x32xf32>
    %c0_45 = arith.constant 0 : index
    %c0_46 = arith.constant 0 : index
    %c0_47 = arith.constant 0 : index
    %145 = vector.load %arg10[%c0_45, %c0_46, %c0_47] : memref<2x1x32xf32, #tpu.memory_space<vmem>>, vector<1x1x32xf32>
    %146 = vector.shape_cast %145 : vector<1x1x32xf32> to vector<1x32xf32>
    %cst_48 = arith.constant dense<0.000000e+00> : vector<16xf32>
    %147 = vector.multi_reduction <add>, %142, %cst_48 [1] : vector<16x32xf32> to vector<16xf32>
    %148 = vector.shape_cast %147 : vector<16xf32> to vector<16x1xf32>
    %cst_49 = arith.constant 3.200000e+01 : f32
    %149 = vector.broadcast %cst_49 : f32 to vector<16x1xf32>
    %150 = arith.divf %148, %149 : vector<16x1xf32>
    %151 = vector.broadcast %150 : vector<16x1xf32> to vector<16x32xf32>
    %152 = arith.subf %142, %151 : vector<16x32xf32>
    %153 = arith.mulf %152, %152 : vector<16x32xf32>
    %cst_50 = arith.constant dense<0.000000e+00> : vector<16xf32>
    %154 = vector.multi_reduction <add>, %153, %cst_50 [1] : vector<16x32xf32> to vector<16xf32>
    %155 = vector.shape_cast %154 : vector<16xf32> to vector<16x1xf32>
    %cst_51 = arith.constant 3.200000e+01 : f32
    %156 = vector.broadcast %cst_51 : f32 to vector<16x1xf32>
    %157 = arith.divf %155, %156 : vector<16x1xf32>
    %cst_52 = arith.constant 9.99999996E-13 : f32
    %158 = vector.broadcast %cst_52 : f32 to vector<16x1xf32>
    %159 = arith.addf %157, %158 : vector<16x1xf32>
    %160 = math.rsqrt %159 : vector<16x1xf32>
    %161 = vector.broadcast %160 : vector<16x1xf32> to vector<16x32xf32>
    %162 = arith.mulf %152, %161 : vector<16x32xf32>
    %163 = vector.broadcast %144 : vector<1x32xf32> to vector<16x32xf32>
    %164 = arith.mulf %162, %163 : vector<16x32xf32>
    %165 = vector.broadcast %146 : vector<1x32xf32> to vector<16x32xf32>
    %166 = arith.addf %164, %165 : vector<16x32xf32>
    %167 = arith.truncf %166 : vector<16x32xf32> to vector<16x32xbf16>
    %c0_53 = arith.constant 0 : index
    %c0_54 = arith.constant 0 : index
    %c0_55 = arith.constant 0 : index
    %168 = vector.load %arg11[%c0_53, %c0_54, %c0_55] : memref<2x32x64xbf16, #tpu.memory_space<vmem>>, vector<1x32x64xbf16>
    %169 = vector.shape_cast %168 : vector<1x32x64xbf16> to vector<32x64xbf16>
    %cst_56 = arith.constant dense<0.000000e+00> : vector<16x64xf32>
    %170 = tpu.matmul %167, %169, %cst_56 {dimension_numbers = #tpu.dot_dimension_numbers<[1], [0], [0], [1], [0, 0, 1, 1], [], []>} : vector<16x32xbf16>, vector<32x64xbf16>, vector<16x64xf32> -> vector<16x64xf32>
    %c0_57 = arith.constant 0 : index
    %c0_58 = arith.constant 0 : index
    %c0_59 = arith.constant 0 : index
    %171 = vector.load %arg12[%c0_57, %c0_58, %c0_59] : memref<2x1x64xf32, #tpu.memory_space<vmem>>, vector<1x1x64xf32>
    %172 = vector.shape_cast %171 : vector<1x1x64xf32> to vector<1x64xf32>
    %173 = vector.broadcast %172 : vector<1x64xf32> to vector<16x64xf32>
    %174 = arith.addf %170, %173 : vector<16x64xf32>
    %cst_60 = arith.constant 5.000000e-01 : f32
    %175 = vector.broadcast %cst_60 : f32 to vector<16x64xf32>
    %176 = arith.mulf %175, %174 : vector<16x64xf32>
    %cst_61 = arith.constant 4.471500e-02 : f32
    %177 = vector.broadcast %cst_61 : f32 to vector<16x64xf32>
    %178 = arith.mulf %177, %174 : vector<16x64xf32>
    %179 = arith.mulf %178, %174 : vector<16x64xf32>
    %180 = arith.mulf %179, %174 : vector<16x64xf32>
    %181 = arith.addf %174, %180 : vector<16x64xf32>
    %cst_62 = arith.constant 0.797884583 : f32
    %182 = vector.broadcast %cst_62 : f32 to vector<16x64xf32>
    %183 = arith.mulf %182, %181 : vector<16x64xf32>
    %184 = math.tanh %183 : vector<16x64xf32>
    %cst_63 = arith.constant 1.000000e+00 : f32
    %185 = vector.broadcast %cst_63 : f32 to vector<16x64xf32>
    %186 = arith.addf %185, %184 : vector<16x64xf32>
    %187 = arith.mulf %176, %186 : vector<16x64xf32>
    %188 = arith.truncf %187 : vector<16x64xf32> to vector<16x64xbf16>
    %c0_64 = arith.constant 0 : index
    %c0_65 = arith.constant 0 : index
    %c0_66 = arith.constant 0 : index
    %189 = vector.load %arg13[%c0_64, %c0_65, %c0_66] : memref<2x64x32xbf16, #tpu.memory_space<vmem>>, vector<1x64x32xbf16>
    %190 = vector.shape_cast %189 : vector<1x64x32xbf16> to vector<64x32xbf16>
    %cst_67 = arith.constant dense<0.000000e+00> : vector<16x32xf32>
    %191 = tpu.matmul %188, %190, %cst_67 {dimension_numbers = #tpu.dot_dimension_numbers<[1], [0], [0], [1], [0, 0, 1, 1], [], []>} : vector<16x64xbf16>, vector<64x32xbf16>, vector<16x32xf32> -> vector<16x32xf32>
    %c0_68 = arith.constant 0 : index
    %c0_69 = arith.constant 0 : index
    %c0_70 = arith.constant 0 : index
    %192 = vector.load %arg14[%c0_68, %c0_69, %c0_70] : memref<2x1x32xf32, #tpu.memory_space<vmem>>, vector<1x1x32xf32>
    %193 = vector.shape_cast %192 : vector<1x1x32xf32> to vector<1x32xf32>
    %194 = vector.broadcast %193 : vector<1x32xf32> to vector<16x32xf32>
    %195 = arith.addf %191, %194 : vector<16x32xf32>
    %196 = arith.addf %195, %166 : vector<16x32xf32>
    %c0_71 = arith.constant 0 : index
    %c0_72 = arith.constant 0 : index
    %c0_73 = arith.constant 0 : index
    %197 = vector.load %arg15[%c0_71, %c0_72, %c0_73] : memref<2x1x32xf32, #tpu.memory_space<vmem>>, vector<1x1x32xf32>
    %198 = vector.shape_cast %197 : vector<1x1x32xf32> to vector<1x32xf32>
    %c0_74 = arith.constant 0 : index
    %c0_75 = arith.constant 0 : index
    %c0_76 = arith.constant 0 : index
    %199 = vector.load %arg16[%c0_74, %c0_75, %c0_76] : memref<2x1x32xf32, #tpu.memory_space<vmem>>, vector<1x1x32xf32>
    %200 = vector.shape_cast %199 : vector<1x1x32xf32> to vector<1x32xf32>
    %cst_77 = arith.constant dense<0.000000e+00> : vector<16xf32>
    %201 = vector.multi_reduction <add>, %196, %cst_77 [1] : vector<16x32xf32> to vector<16xf32>
    %202 = vector.shape_cast %201 : vector<16xf32> to vector<16x1xf32>
    %cst_78 = arith.constant 3.200000e+01 : f32
    %203 = vector.broadcast %cst_78 : f32 to vector<16x1xf32>
    %204 = arith.divf %202, %203 : vector<16x1xf32>
    %205 = vector.broadcast %204 : vector<16x1xf32> to vector<16x32xf32>
    %206 = arith.subf %196, %205 : vector<16x32xf32>
    %207 = arith.mulf %206, %206 : vector<16x32xf32>
    %cst_79 = arith.constant dense<0.000000e+00> : vector<16xf32>
    %208 = vector.multi_reduction <add>, %207, %cst_79 [1] : vector<16x32xf32> to vector<16xf32>
    %209 = vector.shape_cast %208 : vector<16xf32> to vector<16x1xf32>
    %cst_80 = arith.constant 3.200000e+01 : f32
    %210 = vector.broadcast %cst_80 : f32 to vector<16x1xf32>
    %211 = arith.divf %209, %210 : vector<16x1xf32>
    %cst_81 = arith.constant 9.99999996E-13 : f32
    %212 = vector.broadcast %cst_81 : f32 to vector<16x1xf32>
    %213 = arith.addf %211, %212 : vector<16x1xf32>
    %214 = math.rsqrt %213 : vector<16x1xf32>
    %215 = vector.broadcast %214 : vector<16x1xf32> to vector<16x32xf32>
    %216 = arith.mulf %206, %215 : vector<16x32xf32>
    %217 = vector.broadcast %198 : vector<1x32xf32> to vector<16x32xf32>
    %218 = arith.mulf %216, %217 : vector<16x32xf32>
    %219 = vector.broadcast %200 : vector<1x32xf32> to vector<16x32xf32>
    %220 = arith.addf %218, %219 : vector<16x32xf32>
    %221 = arith.truncf %220 : vector<16x32xf32> to vector<16x32xbf16>
    %c1 = arith.constant 1 : index
    %c0_82 = arith.constant 0 : index
    %c0_83 = arith.constant 0 : index
    %222 = vector.load %arg5[%c1, %c0_82, %c0_83] : memref<2x32x96xbf16, #tpu.memory_space<vmem>>, vector<1x32x96xbf16>
    %223 = vector.shape_cast %222 : vector<1x32x96xbf16> to vector<32x96xbf16>
    %cst_84 = arith.constant dense<0.000000e+00> : vector<16x96xf32>
    %224 = tpu.matmul %221, %223, %cst_84 {dimension_numbers = #tpu.dot_dimension_numbers<[1], [0], [0], [1], [0, 0, 1, 1], [], []>} : vector<16x32xbf16>, vector<32x96xbf16>, vector<16x96xf32> -> vector<16x96xf32>
    %c1_85 = arith.constant 1 : index
    %c0_86 = arith.constant 0 : index
    %c0_87 = arith.constant 0 : index
    %225 = vector.load %arg6[%c1_85, %c0_86, %c0_87] : memref<2x1x96xf32, #tpu.memory_space<vmem>>, vector<1x1x96xf32>
    %226 = vector.shape_cast %225 : vector<1x1x96xf32> to vector<1x96xf32>
    %227 = vector.broadcast %226 : vector<1x96xf32> to vector<16x96xf32>
    %228 = arith.addf %224, %227 : vector<16x96xf32>
    %229 = vector.extract_strided_slice %228 {offsets = [0, 0], sizes = [16, 8], strides = [1, 1]} : vector<16x96xf32> to vector<16x8xf32>
    %230 = vector.shape_cast %229 : vector<16x8xf32> to vector<2x8x8xf32>
    %231 = vector.extract_strided_slice %228 {offsets = [0, 32], sizes = [16, 8], strides = [1, 1]} : vector<16x96xf32> to vector<16x8xf32>
    %232 = vector.shape_cast %231 : vector<16x8xf32> to vector<2x8x8xf32>
    %233 = vector.extract_strided_slice %228 {offsets = [0, 64], sizes = [16, 8], strides = [1, 1]} : vector<16x96xf32> to vector<16x8xf32>
    %234 = vector.shape_cast %233 : vector<16x8xf32> to vector<2x8x8xf32>
    %235 = arith.truncf %230 : vector<2x8x8xf32> to vector<2x8x8xbf16>
    %236 = arith.truncf %232 : vector<2x8x8xf32> to vector<2x8x8xbf16>
    "tpu.trace_start"() <{level = 10 : i32, message = "bqd,bkd->bqk"}> : () -> ()
    %cst_88 = arith.constant dense<0.000000e+00> : vector<2x8x8xf32>
    %237 = tpu.matmul %235, %236, %cst_88 {dimension_numbers = #tpu.dot_dimension_numbers<[2], [2], [1], [1], [0, 0, 0, 1, 1, 1], [0], [0]>} : vector<2x8x8xbf16>, vector<2x8x8xbf16>, vector<2x8x8xf32> -> vector<2x8x8xf32>
    "tpu.trace_stop"() : () -> ()
    %238 = vector.broadcast %0 : vector<2x1x8xf32> to vector<2x8x8xf32>
    %239 = arith.addf %237, %238 : vector<2x8x8xf32>
    %cst_89 = arith.constant dense<0xFF800000> : vector<2x8xf32>
    %240 = vector.multi_reduction <maximumf>, %239, %cst_89 [2] : vector<2x8x8xf32> to vector<2x8xf32>
    %241 = vector.shape_cast %240 : vector<2x8xf32> to vector<2x8x1xf32>
    %242 = vector.broadcast %241 : vector<2x8x1xf32> to vector<2x8x8xf32>
    %243 = arith.subf %239, %242 : vector<2x8x8xf32>
    %244 = math.exp %243 : vector<2x8x8xf32>
    %cst_90 = arith.constant dense<0.000000e+00> : vector<2x8xf32>
    %245 = vector.multi_reduction <add>, %244, %cst_90 [2] : vector<2x8x8xf32> to vector<2x8xf32>
    %246 = vector.shape_cast %245 : vector<2x8xf32> to vector<2x8x1xf32>
    %247 = tpu.reciprocal %246 {approx = true} : vector<2x8x1xf32> -> vector<2x8x1xf32>
    %248 = vector.broadcast %247 : vector<2x8x1xf32> to vector<2x8x8xf32>
    %249 = arith.mulf %244, %248 : vector<2x8x8xf32>
    %250 = arith.truncf %249 : vector<2x8x8xf32> to vector<2x8x8xbf16>
    %251 = arith.truncf %234 : vector<2x8x8xf32> to vector<2x8x8xbf16>
    "tpu.trace_start"() <{level = 10 : i32, message = "bqk,bkd->bqd"}> : () -> ()
    %cst_91 = arith.constant dense<0.000000e+00> : vector<2x8x8xf32>
    %252 = tpu.matmul %250, %251, %cst_91 {dimension_numbers = #tpu.dot_dimension_numbers<[2], [1], [1], [2], [0, 0, 0, 1, 1, 2], [0], [0]>} : vector<2x8x8xbf16>, vector<2x8x8xbf16>, vector<2x8x8xf32> -> vector<2x8x8xf32>
    "tpu.trace_stop"() : () -> ()
    %253 = vector.shape_cast %252 : vector<2x8x8xf32> to vector<16x8xf32>
    %254 = vector.extract_strided_slice %228 {offsets = [0, 8], sizes = [16, 8], strides = [1, 1]} : vector<16x96xf32> to vector<16x8xf32>
    %255 = vector.shape_cast %254 : vector<16x8xf32> to vector<2x8x8xf32>
    %256 = vector.extract_strided_slice %228 {offsets = [0, 40], sizes = [16, 8], strides = [1, 1]} : vector<16x96xf32> to vector<16x8xf32>
    %257 = vector.shape_cast %256 : vector<16x8xf32> to vector<2x8x8xf32>
    %258 = vector.extract_strided_slice %228 {offsets = [0, 72], sizes = [16, 8], strides = [1, 1]} : vector<16x96xf32> to vector<16x8xf32>
    %259 = vector.shape_cast %258 : vector<16x8xf32> to vector<2x8x8xf32>
    %260 = arith.truncf %255 : vector<2x8x8xf32> to vector<2x8x8xbf16>
    %261 = arith.truncf %257 : vector<2x8x8xf32> to vector<2x8x8xbf16>
    "tpu.trace_start"() <{level = 10 : i32, message = "bqd,bkd->bqk"}> : () -> ()
    %cst_92 = arith.constant dense<0.000000e+00> : vector<2x8x8xf32>
    %262 = tpu.matmul %260, %261, %cst_92 {dimension_numbers = #tpu.dot_dimension_numbers<[2], [2], [1], [1], [0, 0, 0, 1, 1, 1], [0], [0]>} : vector<2x8x8xbf16>, vector<2x8x8xbf16>, vector<2x8x8xf32> -> vector<2x8x8xf32>
    "tpu.trace_stop"() : () -> ()
    %263 = vector.broadcast %0 : vector<2x1x8xf32> to vector<2x8x8xf32>
    %264 = arith.addf %262, %263 : vector<2x8x8xf32>
    %cst_93 = arith.constant dense<0xFF800000> : vector<2x8xf32>
    %265 = vector.multi_reduction <maximumf>, %264, %cst_93 [2] : vector<2x8x8xf32> to vector<2x8xf32>
    %266 = vector.shape_cast %265 : vector<2x8xf32> to vector<2x8x1xf32>
    %267 = vector.broadcast %266 : vector<2x8x1xf32> to vector<2x8x8xf32>
    %268 = arith.subf %264, %267 : vector<2x8x8xf32>
    %269 = math.exp %268 : vector<2x8x8xf32>
    %cst_94 = arith.constant dense<0.000000e+00> : vector<2x8xf32>
    %270 = vector.multi_reduction <add>, %269, %cst_94 [2] : vector<2x8x8xf32> to vector<2x8xf32>
    %271 = vector.shape_cast %270 : vector<2x8xf32> to vector<2x8x1xf32>
    %272 = tpu.reciprocal %271 {approx = true} : vector<2x8x1xf32> -> vector<2x8x1xf32>
    %273 = vector.broadcast %272 : vector<2x8x1xf32> to vector<2x8x8xf32>
    %274 = arith.mulf %269, %273 : vector<2x8x8xf32>
    %275 = arith.truncf %274 : vector<2x8x8xf32> to vector<2x8x8xbf16>
    %276 = arith.truncf %259 : vector<2x8x8xf32> to vector<2x8x8xbf16>
    "tpu.trace_start"() <{level = 10 : i32, message = "bqk,bkd->bqd"}> : () -> ()
    %cst_95 = arith.constant dense<0.000000e+00> : vector<2x8x8xf32>
    %277 = tpu.matmul %275, %276, %cst_95 {dimension_numbers = #tpu.dot_dimension_numbers<[2], [1], [1], [2], [0, 0, 0, 1, 1, 2], [0], [0]>} : vector<2x8x8xbf16>, vector<2x8x8xbf16>, vector<2x8x8xf32> -> vector<2x8x8xf32>
    "tpu.trace_stop"() : () -> ()
    %278 = vector.shape_cast %277 : vector<2x8x8xf32> to vector<16x8xf32>
    %279 = vector.extract_strided_slice %228 {offsets = [0, 16], sizes = [16, 8], strides = [1, 1]} : vector<16x96xf32> to vector<16x8xf32>
    %280 = vector.shape_cast %279 : vector<16x8xf32> to vector<2x8x8xf32>
    %281 = vector.extract_strided_slice %228 {offsets = [0, 48], sizes = [16, 8], strides = [1, 1]} : vector<16x96xf32> to vector<16x8xf32>
    %282 = vector.shape_cast %281 : vector<16x8xf32> to vector<2x8x8xf32>
    %283 = vector.extract_strided_slice %228 {offsets = [0, 80], sizes = [16, 8], strides = [1, 1]} : vector<16x96xf32> to vector<16x8xf32>
    %284 = vector.shape_cast %283 : vector<16x8xf32> to vector<2x8x8xf32>
    %285 = arith.truncf %280 : vector<2x8x8xf32> to vector<2x8x8xbf16>
    %286 = arith.truncf %282 : vector<2x8x8xf32> to vector<2x8x8xbf16>
    "tpu.trace_start"() <{level = 10 : i32, message = "bqd,bkd->bqk"}> : () -> ()
    %cst_96 = arith.constant dense<0.000000e+00> : vector<2x8x8xf32>
    %287 = tpu.matmul %285, %286, %cst_96 {dimension_numbers = #tpu.dot_dimension_numbers<[2], [2], [1], [1], [0, 0, 0, 1, 1, 1], [0], [0]>} : vector<2x8x8xbf16>, vector<2x8x8xbf16>, vector<2x8x8xf32> -> vector<2x8x8xf32>
    "tpu.trace_stop"() : () -> ()
    %288 = vector.broadcast %0 : vector<2x1x8xf32> to vector<2x8x8xf32>
    %289 = arith.addf %287, %288 : vector<2x8x8xf32>
    %cst_97 = arith.constant dense<0xFF800000> : vector<2x8xf32>
    %290 = vector.multi_reduction <maximumf>, %289, %cst_97 [2] : vector<2x8x8xf32> to vector<2x8xf32>
    %291 = vector.shape_cast %290 : vector<2x8xf32> to vector<2x8x1xf32>
    %292 = vector.broadcast %291 : vector<2x8x1xf32> to vector<2x8x8xf32>
    %293 = arith.subf %289, %292 : vector<2x8x8xf32>
    %294 = math.exp %293 : vector<2x8x8xf32>
    %cst_98 = arith.constant dense<0.000000e+00> : vector<2x8xf32>
    %295 = vector.multi_reduction <add>, %294, %cst_98 [2] : vector<2x8x8xf32> to vector<2x8xf32>
    %296 = vector.shape_cast %295 : vector<2x8xf32> to vector<2x8x1xf32>
    %297 = tpu.reciprocal %296 {approx = true} : vector<2x8x1xf32> -> vector<2x8x1xf32>
    %298 = vector.broadcast %297 : vector<2x8x1xf32> to vector<2x8x8xf32>
    %299 = arith.mulf %294, %298 : vector<2x8x8xf32>
    %300 = arith.truncf %299 : vector<2x8x8xf32> to vector<2x8x8xbf16>
    %301 = arith.truncf %284 : vector<2x8x8xf32> to vector<2x8x8xbf16>
    "tpu.trace_start"() <{level = 10 : i32, message = "bqk,bkd->bqd"}> : () -> ()
    %cst_99 = arith.constant dense<0.000000e+00> : vector<2x8x8xf32>
    %302 = tpu.matmul %300, %301, %cst_99 {dimension_numbers = #tpu.dot_dimension_numbers<[2], [1], [1], [2], [0, 0, 0, 1, 1, 2], [0], [0]>} : vector<2x8x8xbf16>, vector<2x8x8xbf16>, vector<2x8x8xf32> -> vector<2x8x8xf32>
    "tpu.trace_stop"() : () -> ()
    %303 = vector.shape_cast %302 : vector<2x8x8xf32> to vector<16x8xf32>
    %304 = vector.extract_strided_slice %228 {offsets = [0, 24], sizes = [16, 8], strides = [1, 1]} : vector<16x96xf32> to vector<16x8xf32>
    %305 = vector.shape_cast %304 : vector<16x8xf32> to vector<2x8x8xf32>
    %306 = vector.extract_strided_slice %228 {offsets = [0, 56], sizes = [16, 8], strides = [1, 1]} : vector<16x96xf32> to vector<16x8xf32>
    %307 = vector.shape_cast %306 : vector<16x8xf32> to vector<2x8x8xf32>
    %308 = vector.extract_strided_slice %228 {offsets = [0, 88], sizes = [16, 8], strides = [1, 1]} : vector<16x96xf32> to vector<16x8xf32>
    %309 = vector.shape_cast %308 : vector<16x8xf32> to vector<2x8x8xf32>
    %310 = arith.truncf %305 : vector<2x8x8xf32> to vector<2x8x8xbf16>
    %311 = arith.truncf %307 : vector<2x8x8xf32> to vector<2x8x8xbf16>
    "tpu.trace_start"() <{level = 10 : i32, message = "bqd,bkd->bqk"}> : () -> ()
    %cst_100 = arith.constant dense<0.000000e+00> : vector<2x8x8xf32>
    %312 = tpu.matmul %310, %311, %cst_100 {dimension_numbers = #tpu.dot_dimension_numbers<[2], [2], [1], [1], [0, 0, 0, 1, 1, 1], [0], [0]>} : vector<2x8x8xbf16>, vector<2x8x8xbf16>, vector<2x8x8xf32> -> vector<2x8x8xf32>
    "tpu.trace_stop"() : () -> ()
    %313 = vector.broadcast %0 : vector<2x1x8xf32> to vector<2x8x8xf32>
    %314 = arith.addf %312, %313 : vector<2x8x8xf32>
    %cst_101 = arith.constant dense<0xFF800000> : vector<2x8xf32>
    %315 = vector.multi_reduction <maximumf>, %314, %cst_101 [2] : vector<2x8x8xf32> to vector<2x8xf32>
    %316 = vector.shape_cast %315 : vector<2x8xf32> to vector<2x8x1xf32>
    %317 = vector.broadcast %316 : vector<2x8x1xf32> to vector<2x8x8xf32>
    %318 = arith.subf %314, %317 : vector<2x8x8xf32>
    %319 = math.exp %318 : vector<2x8x8xf32>
    %cst_102 = arith.constant dense<0.000000e+00> : vector<2x8xf32>
    %320 = vector.multi_reduction <add>, %319, %cst_102 [2] : vector<2x8x8xf32> to vector<2x8xf32>
    %321 = vector.shape_cast %320 : vector<2x8xf32> to vector<2x8x1xf32>
    %322 = tpu.reciprocal %321 {approx = true} : vector<2x8x1xf32> -> vector<2x8x1xf32>
    %323 = vector.broadcast %322 : vector<2x8x1xf32> to vector<2x8x8xf32>
    %324 = arith.mulf %319, %323 : vector<2x8x8xf32>
    %325 = arith.truncf %324 : vector<2x8x8xf32> to vector<2x8x8xbf16>
    %326 = arith.truncf %309 : vector<2x8x8xf32> to vector<2x8x8xbf16>
    "tpu.trace_start"() <{level = 10 : i32, message = "bqk,bkd->bqd"}> : () -> ()
    %cst_103 = arith.constant dense<0.000000e+00> : vector<2x8x8xf32>
    %327 = tpu.matmul %325, %326, %cst_103 {dimension_numbers = #tpu.dot_dimension_numbers<[2], [1], [1], [2], [0, 0, 0, 1, 1, 2], [0], [0]>} : vector<2x8x8xbf16>, vector<2x8x8xbf16>, vector<2x8x8xf32> -> vector<2x8x8xf32>
    "tpu.trace_stop"() : () -> ()
    %328 = vector.shape_cast %327 : vector<2x8x8xf32> to vector<16x8xf32>
    %329 = tpu.concatenate %253, %278, %303, %328 in 1 : vector<16x8xf32>, vector<16x8xf32>, vector<16x8xf32>, vector<16x8xf32> -> vector<16x32xf32>
    %330 = arith.truncf %329 : vector<16x32xf32> to vector<16x32xbf16>
    %c1_104 = arith.constant 1 : index
    %c0_105 = arith.constant 0 : index
    %c0_106 = arith.constant 0 : index
    %331 = vector.load %arg7[%c1_104, %c0_105, %c0_106] : memref<2x32x32xbf16, #tpu.memory_space<vmem>>, vector<1x32x32xbf16>
    %332 = vector.shape_cast %331 : vector<1x32x32xbf16> to vector<32x32xbf16>
    %cst_107 = arith.constant dense<0.000000e+00> : vector<16x32xf32>
    %333 = tpu.matmul %330, %332, %cst_107 {dimension_numbers = #tpu.dot_dimension_numbers<[1], [0], [0], [1], [0, 0, 1, 1], [], []>} : vector<16x32xbf16>, vector<32x32xbf16>, vector<16x32xf32> -> vector<16x32xf32>
    %c1_108 = arith.constant 1 : index
    %c0_109 = arith.constant 0 : index
    %c0_110 = arith.constant 0 : index
    %334 = vector.load %arg8[%c1_108, %c0_109, %c0_110] : memref<2x1x32xf32, #tpu.memory_space<vmem>>, vector<1x1x32xf32>
    %335 = vector.shape_cast %334 : vector<1x1x32xf32> to vector<1x32xf32>
    %336 = vector.broadcast %335 : vector<1x32xf32> to vector<16x32xf32>
    %337 = arith.addf %333, %336 : vector<16x32xf32>
    %338 = arith.addf %337, %220 : vector<16x32xf32>
    %c1_111 = arith.constant 1 : index
    %c0_112 = arith.constant 0 : index
    %c0_113 = arith.constant 0 : index
    %339 = vector.load %arg9[%c1_111, %c0_112, %c0_113] : memref<2x1x32xf32, #tpu.memory_space<vmem>>, vector<1x1x32xf32>
    %340 = vector.shape_cast %339 : vector<1x1x32xf32> to vector<1x32xf32>
    %c1_114 = arith.constant 1 : index
    %c0_115 = arith.constant 0 : index
    %c0_116 = arith.constant 0 : index
    %341 = vector.load %arg10[%c1_114, %c0_115, %c0_116] : memref<2x1x32xf32, #tpu.memory_space<vmem>>, vector<1x1x32xf32>
    %342 = vector.shape_cast %341 : vector<1x1x32xf32> to vector<1x32xf32>
    %cst_117 = arith.constant dense<0.000000e+00> : vector<16xf32>
    %343 = vector.multi_reduction <add>, %338, %cst_117 [1] : vector<16x32xf32> to vector<16xf32>
    %344 = vector.shape_cast %343 : vector<16xf32> to vector<16x1xf32>
    %cst_118 = arith.constant 3.200000e+01 : f32
    %345 = vector.broadcast %cst_118 : f32 to vector<16x1xf32>
    %346 = arith.divf %344, %345 : vector<16x1xf32>
    %347 = vector.broadcast %346 : vector<16x1xf32> to vector<16x32xf32>
    %348 = arith.subf %338, %347 : vector<16x32xf32>
    %349 = arith.mulf %348, %348 : vector<16x32xf32>
    %cst_119 = arith.constant dense<0.000000e+00> : vector<16xf32>
    %350 = vector.multi_reduction <add>, %349, %cst_119 [1] : vector<16x32xf32> to vector<16xf32>
    %351 = vector.shape_cast %350 : vector<16xf32> to vector<16x1xf32>
    %cst_120 = arith.constant 3.200000e+01 : f32
    %352 = vector.broadcast %cst_120 : f32 to vector<16x1xf32>
    %353 = arith.divf %351, %352 : vector<16x1xf32>
    %cst_121 = arith.constant 9.99999996E-13 : f32
    %354 = vector.broadcast %cst_121 : f32 to vector<16x1xf32>
    %355 = arith.addf %353, %354 : vector<16x1xf32>
    %356 = math.rsqrt %355 : vector<16x1xf32>
    %357 = vector.broadcast %356 : vector<16x1xf32> to vector<16x32xf32>
    %358 = arith.mulf %348, %357 : vector<16x32xf32>
    %359 = vector.broadcast %340 : vector<1x32xf32> to vector<16x32xf32>
    %360 = arith.mulf %358, %359 : vector<16x32xf32>
    %361 = vector.broadcast %342 : vector<1x32xf32> to vector<16x32xf32>
    %362 = arith.addf %360, %361 : vector<16x32xf32>
    %363 = arith.truncf %362 : vector<16x32xf32> to vector<16x32xbf16>
    %c1_122 = arith.constant 1 : index
    %c0_123 = arith.constant 0 : index
    %c0_124 = arith.constant 0 : index
    %364 = vector.load %arg11[%c1_122, %c0_123, %c0_124] : memref<2x32x64xbf16, #tpu.memory_space<vmem>>, vector<1x32x64xbf16>
    %365 = vector.shape_cast %364 : vector<1x32x64xbf16> to vector<32x64xbf16>
    %cst_125 = arith.constant dense<0.000000e+00> : vector<16x64xf32>
    %366 = tpu.matmul %363, %365, %cst_125 {dimension_numbers = #tpu.dot_dimension_numbers<[1], [0], [0], [1], [0, 0, 1, 1], [], []>} : vector<16x32xbf16>, vector<32x64xbf16>, vector<16x64xf32> -> vector<16x64xf32>
    %c1_126 = arith.constant 1 : index
    %c0_127 = arith.constant 0 : index
    %c0_128 = arith.constant 0 : index
    %367 = vector.load %arg12[%c1_126, %c0_127, %c0_128] : memref<2x1x64xf32, #tpu.memory_space<vmem>>, vector<1x1x64xf32>
    %368 = vector.shape_cast %367 : vector<1x1x64xf32> to vector<1x64xf32>
    %369 = vector.broadcast %368 : vector<1x64xf32> to vector<16x64xf32>
    %370 = arith.addf %366, %369 : vector<16x64xf32>
    %cst_129 = arith.constant 5.000000e-01 : f32
    %371 = vector.broadcast %cst_129 : f32 to vector<16x64xf32>
    %372 = arith.mulf %371, %370 : vector<16x64xf32>
    %cst_130 = arith.constant 4.471500e-02 : f32
    %373 = vector.broadcast %cst_130 : f32 to vector<16x64xf32>
    %374 = arith.mulf %373, %370 : vector<16x64xf32>
    %375 = arith.mulf %374, %370 : vector<16x64xf32>
    %376 = arith.mulf %375, %370 : vector<16x64xf32>
    %377 = arith.addf %370, %376 : vector<16x64xf32>
    %cst_131 = arith.constant 0.797884583 : f32
    %378 = vector.broadcast %cst_131 : f32 to vector<16x64xf32>
    %379 = arith.mulf %378, %377 : vector<16x64xf32>
    %380 = math.tanh %379 : vector<16x64xf32>
    %cst_132 = arith.constant 1.000000e+00 : f32
    %381 = vector.broadcast %cst_132 : f32 to vector<16x64xf32>
    %382 = arith.addf %381, %380 : vector<16x64xf32>
    %383 = arith.mulf %372, %382 : vector<16x64xf32>
    %384 = arith.truncf %383 : vector<16x64xf32> to vector<16x64xbf16>
    %c1_133 = arith.constant 1 : index
    %c0_134 = arith.constant 0 : index
    %c0_135 = arith.constant 0 : index
    %385 = vector.load %arg13[%c1_133, %c0_134, %c0_135] : memref<2x64x32xbf16, #tpu.memory_space<vmem>>, vector<1x64x32xbf16>
    %386 = vector.shape_cast %385 : vector<1x64x32xbf16> to vector<64x32xbf16>
    %cst_136 = arith.constant dense<0.000000e+00> : vector<16x32xf32>
    %387 = tpu.matmul %384, %386, %cst_136 {dimension_numbers = #tpu.dot_dimension_numbers<[1], [0], [0], [1], [0, 0, 1, 1], [], []>} : vector<16x64xbf16>, vector<64x32xbf16>, vector<16x32xf32> -> vector<16x32xf32>
    %c1_137 = arith.constant 1 : index
    %c0_138 = arith.constant 0 : index
    %c0_139 = arith.constant 0 : index
    %388 = vector.load %arg14[%c1_137, %c0_138, %c0_139] : memref<2x1x32xf32, #tpu.memory_space<vmem>>, vector<1x1x32xf32>
    %389 = vector.shape_cast %388 : vector<1x1x32xf32> to vector<1x32xf32>
    %390 = vector.broadcast %389 : vector<1x32xf32> to vector<16x32xf32>
    %391 = arith.addf %387, %390 : vector<16x32xf32>
    %392 = arith.addf %391, %362 : vector<16x32xf32>
    %c1_140 = arith.constant 1 : index
    %c0_141 = arith.constant 0 : index
    %c0_142 = arith.constant 0 : index
    %393 = vector.load %arg15[%c1_140, %c0_141, %c0_142] : memref<2x1x32xf32, #tpu.memory_space<vmem>>, vector<1x1x32xf32>
    %394 = vector.shape_cast %393 : vector<1x1x32xf32> to vector<1x32xf32>
    %c1_143 = arith.constant 1 : index
    %c0_144 = arith.constant 0 : index
    %c0_145 = arith.constant 0 : index
    %395 = vector.load %arg16[%c1_143, %c0_144, %c0_145] : memref<2x1x32xf32, #tpu.memory_space<vmem>>, vector<1x1x32xf32>
    %396 = vector.shape_cast %395 : vector<1x1x32xf32> to vector<1x32xf32>
    %cst_146 = arith.constant dense<0.000000e+00> : vector<16xf32>
    %397 = vector.multi_reduction <add>, %392, %cst_146 [1] : vector<16x32xf32> to vector<16xf32>
    %398 = vector.shape_cast %397 : vector<16xf32> to vector<16x1xf32>
    %cst_147 = arith.constant 3.200000e+01 : f32
    %399 = vector.broadcast %cst_147 : f32 to vector<16x1xf32>
    %400 = arith.divf %398, %399 : vector<16x1xf32>
    %401 = vector.broadcast %400 : vector<16x1xf32> to vector<16x32xf32>
    %402 = arith.subf %392, %401 : vector<16x32xf32>
    %403 = arith.mulf %402, %402 : vector<16x32xf32>
    %cst_148 = arith.constant dense<0.000000e+00> : vector<16xf32>
    %404 = vector.multi_reduction <add>, %403, %cst_148 [1] : vector<16x32xf32> to vector<16xf32>
    %405 = vector.shape_cast %404 : vector<16xf32> to vector<16x1xf32>
    %cst_149 = arith.constant 3.200000e+01 : f32
    %406 = vector.broadcast %cst_149 : f32 to vector<16x1xf32>
    %407 = arith.divf %405, %406 : vector<16x1xf32>
    %cst_150 = arith.constant 9.99999996E-13 : f32
    %408 = vector.broadcast %cst_150 : f32 to vector<16x1xf32>
    %409 = arith.addf %407, %408 : vector<16x1xf32>
    %410 = math.rsqrt %409 : vector<16x1xf32>
    %411 = vector.broadcast %410 : vector<16x1xf32> to vector<16x32xf32>
    %412 = arith.mulf %402, %411 : vector<16x32xf32>
    %413 = vector.broadcast %394 : vector<1x32xf32> to vector<16x32xf32>
    %414 = arith.mulf %412, %413 : vector<16x32xf32>
    %415 = vector.broadcast %396 : vector<1x32xf32> to vector<16x32xf32>
    %416 = arith.addf %414, %415 : vector<16x32xf32>
    %417 = vector.extract_strided_slice %416 {offsets = [0, 0], sizes = [1, 32], strides = [1, 1]} : vector<16x32xf32> to vector<1x32xf32>
    %418 = vector.extract_strided_slice %416 {offsets = [8, 0], sizes = [1, 32], strides = [1, 1]} : vector<16x32xf32> to vector<1x32xf32>
    %419 = tpu.concatenate %417, %418 in 0 : vector<1x32xf32>, vector<1x32xf32> -> vector<2x32xf32>
    %420 = arith.truncf %419 : vector<2x32xf32> to vector<2x32xbf16>
    %c0_151 = arith.constant 0 : index
    %c0_152 = arith.constant 0 : index
    %421 = vector.load %arg17[%c0_151, %c0_152] : memref<32x2xbf16, #tpu.memory_space<vmem>>, vector<32x2xbf16>
    %cst_153 = arith.constant dense<0.000000e+00> : vector<2x2xf32>
    %422 = tpu.matmul %420, %421, %cst_153 {dimension_numbers = #tpu.dot_dimension_numbers<[1], [0], [0], [1], [0, 0, 1, 1], [], []>} : vector<2x32xbf16>, vector<32x2xbf16>, vector<2x2xf32> -> vector<2x2xf32>
    %c0_154 = arith.constant 0 : index
    %c0_155 = arith.constant 0 : index
    %423 = vector.load %arg18[%c0_154, %c0_155] : memref<1x2xf32, #tpu.memory_space<vmem>>, vector<1x2xf32>
    %424 = vector.broadcast %423 : vector<1x2xf32> to vector<2x2xf32>
    %425 = arith.addf %422, %424 : vector<2x2xf32>
    %c0_156 = arith.constant 0 : index
    %c0_157 = arith.constant 0 : index
    %426 = vector.load %arg19[%c0_156, %c0_157] : memref<2x2xf32, #tpu.memory_space<vmem>>, vector<2x2xf32>
    tpu.vector_store %arg19[%c0_156, %c0_157], %425 {strides = array<i32>} : memref<2x2xf32, #tpu.memory_space<vmem>>, vector<2x2xf32>,
    return
  }
  func.func @transform_0(%arg0: i32) -> (i32, i32) {
    %c0_i32 = arith.constant 0 : i32
    %c0_i32_0 = arith.constant 0 : i32
    %c0_i32_1 = arith.constant 0 : i32
    return %c0_i32, %c0_i32_0 : i32, i32
  }
  func.func @transform_1(%arg0: i32) -> (i32, i32, i32) {
    %c0_i32 = arith.constant 0 : i32
    %c0_i32_0 = arith.constant 0 : i32
    %c0_i32_1 = arith.constant 0 : i32
    %c0_i32_2 = arith.constant 0 : i32
    return %c0_i32, %c0_i32_0, %c0_i32_1 : i32, i32, i32
  }
  func.func @transform_2(%arg0: i32) -> (i32, i32) {
    %c0_i32 = arith.constant 0 : i32
    %c0_i32_0 = arith.constant 0 : i32
    %c0_i32_1 = arith.constant 0 : i32
    return %c0_i32, %c0_i32_0 : i32, i32
  }
  func.func @transform_3(%arg0: i32) -> (i32, i32) {
    %c0_i32 = arith.constant 0 : i32
    %c0_i32_0 = arith.constant 0 : i32
    %c0_i32_1 = arith.constant 0 : i32
    return %c0_i32, %c0_i32_0 : i32, i32
  }
  func.func @transform_4(%arg0: i32) -> (i32, i32, i32) {
    %c0_i32 = arith.constant 0 : i32
    %c0_i32_0 = arith.constant 0 : i32
    %c0_i32_1 = arith.constant 0 : i32
    %c0_i32_2 = arith.constant 0 : i32
    return %c0_i32, %c0_i32_0, %c0_i32_1 : i32, i32, i32
  }
  func.func @transform_5(%arg0: i32) -> (i32, i32, i32) {
    %c0_i32 = arith.constant 0 : i32
    %c0_i32_0 = arith.constant 0 : i32
    %c0_i32_1 = arith.constant 0 : i32
    %c0_i32_2 = arith.constant 0 : i32
    return %c0_i32, %c0_i32_0, %c0_i32_1 : i32, i32, i32
  }
  func.func @transform_6(%arg0: i32) -> (i32, i32, i32) {
    %c0_i32 = arith.constant 0 : i32
    %c0_i32_0 = arith.constant 0 : i32
    %c0_i32_1 = arith.constant 0 : i32
    %c0_i32_2 = arith.constant 0 : i32
    return %c0_i32, %c0_i32_0, %c0_i32_1 : i32, i32, i32
  }
  func.func @transform_7(%arg0: i32) -> (i32, i32, i32) {
    %c0_i32 = arith.constant 0 : i32
    %c0_i32_0 = arith.constant 0 : i32
    %c0_i32_1 = arith.constant 0 : i32
    %c0_i32_2 = arith.constant 0 : i32
    return %c0_i32, %c0_i32_0, %c0_i32_1 : i32, i32, i32
  }
  func.func @transform_8(%arg0: i32) -> (i32, i32, i32) {
    %c0_i32 = arith.constant 0 : i32
    %c0_i32_0 = arith.constant 0 : i32
    %c0_i32_1 = arith.constant 0 : i32
    %c0_i32_2 = arith.constant 0 : i32
    return %c0_i32, %c0_i32_0, %c0_i32_1 : i32, i32, i32
  }
  func.func @transform_9(%arg0: i32) -> (i32, i32, i32) {
    %c0_i32 = arith.constant 0 : i32
    %c0_i32_0 = arith.constant 0 : i32
    %c0_i32_1 = arith.constant 0 : i32
    %c0_i32_2 = arith.constant 0 : i32
    return %c0_i32, %c0_i32_0, %c0_i32_1 : i32, i32, i32
  }
  func.func @transform_10(%arg0: i32) -> (i32, i32, i32) {
    %c0_i32 = arith.constant 0 : i32
    %c0_i32_0 = arith.constant 0 : i32
    %c0_i32_1 = arith.constant 0 : i32
    %c0_i32_2 = arith.constant 0 : i32
    return %c0_i32, %c0_i32_0, %c0_i32_1 : i32, i32, i32
  }
  func.func @transform_11(%arg0: i32) -> (i32, i32, i32) {
    %c0_i32 = arith.constant 0 : i32
    %c0_i32_0 = arith.constant 0 : i32
    %c0_i32_1 = arith.constant 0 : i32
    %c0_i32_2 = arith.constant 0 : i32
    return %c0_i32, %c0_i32_0, %c0_i32_1 : i32, i32, i32
  }
  func.func @transform_12(%arg0: i32) -> (i32, i32, i32) {
    %c0_i32 = arith.constant 0 : i32
    %c0_i32_0 = arith.constant 0 : i32
    %c0_i32_1 = arith.constant 0 : i32
    %c0_i32_2 = arith.constant 0 : i32
    return %c0_i32, %c0_i32_0, %c0_i32_1 : i32, i32, i32
  }
  func.func @transform_13(%arg0: i32) -> (i32, i32, i32) {
    %c0_i32 = arith.constant 0 : i32
    %c0_i32_0 = arith.constant 0 : i32
    %c0_i32_1 = arith.constant 0 : i32
    %c0_i32_2 = arith.constant 0 : i32
    return %c0_i32, %c0_i32_0, %c0_i32_1 : i32, i32, i32
  }
  func.func @transform_14(%arg0: i32) -> (i32, i32, i32) {
    %c0_i32 = arith.constant 0 : i32
    %c0_i32_0 = arith.constant 0 : i32
    %c0_i32_1 = arith.constant 0 : i32
    %c0_i32_2 = arith.constant 0 : i32
    return %c0_i32, %c0_i32_0, %c0_i32_1 : i32, i32, i32
  }
  func.func @transform_15(%arg0: i32) -> (i32, i32, i32) {
    %c0_i32 = arith.constant 0 : i32
    %c0_i32_0 = arith.constant 0 : i32
    %c0_i32_1 = arith.constant 0 : i32
    %c0_i32_2 = arith.constant 0 : i32
    return %c0_i32, %c0_i32_0, %c0_i32_1 : i32, i32, i32
  }
  func.func @transform_16(%arg0: i32) -> (i32, i32) {
    %c0_i32 = arith.constant 0 : i32
    %c0_i32_0 = arith.constant 0 : i32
    %c0_i32_1 = arith.constant 0 : i32
    return %c0_i32, %c0_i32_0 : i32, i32
  }
  func.func @transform_17(%arg0: i32) -> (i32, i32) {
    %c0_i32 = arith.constant 0 : i32
    %c0_i32_0 = arith.constant 0 : i32
    %c0_i32_1 = arith.constant 0 : i32
    return %c0_i32, %c0_i32_0 : i32, i32
  }
  func.func @transform_18(%arg0: i32) -> (i32, i32) {
    %c0_i32 = arith.constant 0 : i32
    %c0_i32_0 = arith.constant 0 : i32
    %c0_i32_1 = arith.constant 0 : i32
    return %c0_i32, %c0_i32_0 : i32, i32
  }
}

</mosaic_0001>

<bundles_post_ra>
// kernel: bert_sentiment_forward.1
= control target key start
LH: loop header
LB: loop body
LE: loop exit
PB: predicated region body
PF: predicated region fallthrough
CT: control target
= control target key end

     0   :  { %s4227_s0 = inlined_call_operand.vmem [shape: bf16[16,32], index: 0, kind: input, shape index: {}]   ;;  %s4228_s1 = inlined_call_operand.vmem [shape: f32[2,1,8], index: 1, kind: input, shape index: {}]   ;;  %s4229_s2 = inlined_call_operand.vmem [shape: f32[1,32], index: 2, kind: input, shape index: {}]   ;;  %s4230_s3 = inlined_call_operand.vmem [shape: f32[1,32], index: 3, kind: input, shape index: {}]   ;;  %s4231_s4 = inlined_call_operand.vmem [shape: bf16[2,32,96], index: 4, kind: input, shape index: {}]   ;;  %s4232_s5 = inlined_call_operand.vmem [shape: f32[2,1,96], index: 5, kind: input, shape index: {}]   ;;  %s4233_s6 = inlined_call_operand.vmem [shape: bf16[2,32,32], index: 6, kind: input, shape index: {}]   ;;  %s4234_s7 = inlined_call_operand.vmem [shape: f32[2,1,32], index: 7, kind: input, shape index: {}]   ;;  %s4235_s8 = inlined_call_operand.vmem [shape: f32[2,1,32], index: 8, kind: input, shape index: {}]   ;;  %s4236_s9 = inlined_call_operand.vmem [shape: f32[2,1,32], index: 9, kind: input, shape index: {}]   ;;  %s4237_s10 = inlined_call_operand.vmem [shape: bf16[2,32,64], index: 10, kind: input, shape index: {}]   ;;  %s4238_s11 = inlined_call_operand.vmem [shape: f32[2,1,64], index: 11, kind: input, shape index: {}]   ;;  %s4239_s12 = inlined_call_operand.vmem [shape: bf16[2,64,32], index: 12, kind: input, shape index: {}]   ;;  %s4240_s13 = inlined_call_operand.vmem [shape: f32[2,1,32], index: 13, kind: input, shape index: {}]   ;;  %s4241_s14 = inlined_call_operand.vmem [shape: f32[2,1,32], index: 14, kind: input, shape index: {}]   ;;  %s4242_s15 = inlined_call_operand.vmem [shape: f32[2,1,32], index: 15, kind: input, shape index: {}]   ;;  %s4243_s16 = inlined_call_operand.vmem [shape: bf16[32,2], index: 16, kind: input, shape index: {}]   ;;  %s4244_s17 = inlined_call_operand.vmem [shape: f32[1,2], index: 17, kind: input, shape index: {}]   ;;  %s4245_s18 = inlined_call_operand.hbm [shape: f32[2,2], index: 18, kind: output, shape index: {}]  }
   0x1   :  { %4258 = sst [smem:[#allocation5_spill]] %s4227_s0 }
   0x2   :  { %4259 = sst [smem:[#allocation6_spill]] %s4228_s1 }
   0x3   :  { %4260 = sst [smem:[#allocation7_spill]] %s4229_s2 }
   0x4   :  { %s4261_s29 = sld [smem:[#allocation5_spill]]  ;;  %vm69_vm0 = vcmask 261120  }
   0xa   :  { %v2959_v0 = vld [vmem:[%s4261_s29] sm:$0xff]  }
   0xb   :  { %v2960_v1 = vunpack.c.l.bf16 %v2959_v0  ;;  %v2961_v2 = vunpack.c.h.bf16 %v2959_v0 }
   0xd   :  { %v70_v3 = vsel %vm69_vm0, %v2960_v1, 0.0  ;;  %v73_v4 = vsel %vm69_vm0, %v2961_v2, 0.0 }
   0xe   :  { %71 = vadd.xlane.f32.xlu0 %v70_v3 }
  0x12   :  { %74 = vadd.xlane.f32.xlu0 %v73_v4 }
  0x13   :  { %23 = vsyncpa [#allocation3], 0  ;;  %v3376_v15 = vld [vmem:[%s4231_s4] sm:$0xff]   ;;  %v3516_v16 = vmov 0.0   ;;  %vm3517_vm1 = vmmov 0   ;;  %v3377_v17 = vld [vmem:[%s4231_s4 + $0x8] sm:$0xff]  }
  0x14   :  { %3057 = vmatprep.subr.bf16.mxu0 %v3516_v16  ;;  %3061 = vmatprep.mubr.msk.bf16.mxu0 %vm3517_vm1, %v3516_v16  ;;  %s4262_s22 = sld [smem:[#allocation7_spill]]  ;;  %v2847_v30 = vld [vmem:[%s4230_s3] ss:$0 sm:$0xff]  ;;  %s3518_s3 = smov 96   ;;  %vm198_vm2 = vcmask 64512   ;;  %vm323_vm3 = vcmask 1043456  }
  0x15   :  { %3058 = vmatpush3.bf16.msra.mxu0 %v3376_v15  ;;  %3065 = vmatprep.subr.bf16.mxu1 %v3516_v16  ;;  %v2848_v35 = vld [vmem:[%s4232_s5] ss:$0 sm:$0xff]  ;;  %s4263_s28 = sld [smem:[#allocation6_spill]]  ;;  %s3519_s0 = smov 64   ;;  %vm1101_vm4 = vcmask 130048   ;;  %vm1104_vm5 = vcmask 195584  }
  0x16   :  { %3059 = vmatprep.subr.bf16.mxu0 %v3516_v16  ;;  %3067 = vmatprep.mubr.msk.bf16.mxu1 %vm3517_vm1, %v3516_v16  ;;  %s3520_s19 = smov 88   ;;  %s3521_s1 = smov 120   ;;  %vm1347_vm6 = vcmask 523264   ;;  %vm2761_vm7 = vcmask 1040384   ;;  %vm2830_vm8 = vcmask 9216  }
  0x17   :  { %s3522_s20 = smov 56   ;;  %s3523_s21 = smov 80  }
  0x18   :  { %s4256_s2 = smov 48   ;;  %s4254_s23 = smov 72  }
  0x19   :  { %3060 = vmatpush3.bf16.msra.mxu0 %v3377_v17  ;;  %s4252_s24 = smov 104   ;;  %s4250_s25 = smov 40  }
  0x1a   :  { %3071 = vmatprep.subr.bf16.mxu0 %v3516_v16  ;;  %v2846_v26 = vld [vmem:[%s4262_s22] ss:$0 sm:$0xff]  ;;  %s3524_s22 = smov 112   ;;  %s4248_s26 = smov 8  }
  0x1b   :  { %v3690_v48 = vld [vmem:[%s4263_s28] ss:$0 sm:$0xff]  ;;  %v3695_v50 = vld [vmem:[%s4263_s28 + $0x1] ss:$0 sm:$0xff]  ;;  %s4247_s27 = smov 16   ;;  %s4249_s29 = smov 24  }
  0x9b   :  { %v72_v5 = vpop.xlane.xlu0 %71 }
  0x9c   :  { %v77_v6 = vmul.f32 0.03125, %v72_v5 }
  0x9e   :  { %v79_v7 = vsub.f32 %v2960_v1, %v77_v6 }
  0x9f   :  { %v75_v8 = vpop.xlane.xlu0 %74 }
  0xa0   :  { %v78_v9 = vmul.f32 0.03125, %v75_v8  ;;  %v81_v10 = vmul.f32 %v79_v7, %v79_v7 }
  0xa2   :  { %v80_v11 = vsub.f32 %v2961_v2, %v78_v9  ;;  %v83_v12 = vsel %vm69_vm0, %v81_v10, 0.0 }
  0xa3   :  { %84 = vadd.xlane.f32.xlu1 %v83_v12 }
  0xa4   :  { %v82_v13 = vmul.f32 %v80_v11, %v80_v11 }
  0xa6   :  { %v86_v14 = vsel %vm69_vm0, %v82_v13, 0.0 }
  0xa7   :  { %87 = vadd.xlane.f32.xlu1 %v86_v14 }
 0x130   :  { %v85_v18 = vpop.xlane.xlu1 %84 }
 0x131   :  { %v89_v19 = vmul.f32 0.03125, %v85_v18 }
 0x133   :  { %v91_v20 = vadd.f32 1e-12, %v89_v19 }
 0x134   :  { %v88_v21 = vpop.xlane.xlu1 %87 }
 0x135   :  { %3398 = vrsqrt.f32 %v91_v20  ;;  %v90_v22 = vmul.f32 0.03125, %v88_v21 }
 0x137   :  { %v92_v23 = vadd.f32 1e-12, %v90_v22 }
 0x139   :  { %3400 = vrsqrt.f32 %v92_v23 }
 0x13f   :  { %v3399_v24 = vpop.eup %3398 }
 0x140   :  { %v95_v25 = vmul.f32 %v3399_v24, %v79_v7 }
 0x142   :  { %v103_v29 = vmul.f32 %v2846_v26, %v95_v25 }
 0x143   :  { %v3401_v27 = vpop.eup %3400 }
 0x144   :  { %v96_v28 = vmul.f32 %v3401_v27, %v80_v11  ;;  %v3655_v32 = vadd.f32 %v2847_v30, %v103_v29 }
 0x146   :  { %v104_v31 = vmul.f32 %v2846_v26, %v96_v28 }
 0x148   :  { %v3657_v33 = vadd.f32 %v2847_v30, %v104_v31 }
 0x14a   :  { %v113_v34 = vpack.c.bf16 %v3657_v33, %v3655_v32 }
 0x14c   :  { %3062 = vmatmul.mubr.msk.bf16.vlgmr.msra.gmra.mrb[0].mxu0 %vm69_vm0, %v113_v34 }
 0x14d   :  { %3073 = vmatprep.mubr.msk.bf16.mxu0 %vm3517_vm1, %v3516_v16 }
 0x21f   :  { %v174_v36 = vpop.f32.mrb[0].mxu0 }
 0x220   :  { %v175_v37 = vadd.f32 %v2848_v35, %v174_v36  ;;  %v3063_v38 = vpop.f32.mrb[1].mxu0 }
 0x221   :  { %v177_v39 = vpop.f32.mrb[2].mxu0 }
 0x222   :  { %v3667_v40 = vpack.c.bf16 %v175_v37, %v175_v37  ;;  %v178_v41 = vadd.f32 %v2848_v35, %v177_v39  ;;  %v3064_v42 = vpop.f32.mrb[3].mxu0 }
 0x224   :  { %v3669_v43 = vpack.c.bf16 %v178_v41, %v178_v41  ;;  %196 = vrot.lane.b32.xlu0 %v3667_v40, %s3518_s3 }
 0x226   :  { %246 = vrot.lane.b32.xlu1 %v3669_v43, %s3518_s3 }
 0x296   :  { %v197_v44 = vpop.permute.xlu0 %196 }
 0x297   :  { %v203_v45 = vsel %vm198_vm2, %v197_v44, 0 }
 0x298   :  { %3066 = vmatpush3.bf16.xpose.msra.mxu1 %v203_v45  ;;  %v247_v46 = vpop.permute.xlu1 %246 }
 0x299   :  { %v252_v47 = vsel %vm198_vm2, %v247_v46, 0  ;;  %3077 = vmatprep.subr.bf16.mxu1 %v3516_v16 }
 0x29a   :  { %3072 = vmatpush3.bf16.xpose.msra.mxu0 %v252_v47 }
 0x29b   :  { %3083 = vmatprep.subr.bf16.mxu0 %v3516_v16 }
 0x29f   :  { %3068 = vmatmul.mubr.msk.bf16.vlgmr.msra.gmra.mrb[0].mxu1 %vm198_vm2, %v3667_v40 }
 0x2a0   :  { %3079 = vmatprep.mubr.msk.bf16.mxu1 %vm3517_vm1, %v3516_v16 }
 0x2a1   :  { %3074 = vmatmul.mubr.msk.bf16.vlgmr.msra.gmra.mrb[4].mxu0 %vm198_vm2, %v3669_v43 }
 0x2a2   :  { %3085 = vmatprep.mubr.msk.bf16.mxu0 %vm3517_vm1, %v3516_v16 }
 0x372   :  { %v239_v49 = vpop.f32.mrb[0].mxu1 }
 0x373   :  { %v240_v51 = vadd.f32 %v3690_v48, %v239_v49  ;;  %v3069_v52 = vpop.f32.mrb[1].mxu1 }
 0x374   :  { %v242_v53 = vpop.f32.mrb[2].mxu1  ;;  %v288_v54 = vpop.f32.mrb[4].mxu0 }
 0x375   :  { %v289_v55 = vadd.f32 %v3695_v50, %v288_v54  ;;  %v3070_v56 = vpop.f32.mrb[3].mxu1  ;;  %v3075_v57 = vpop.f32.mrb[5].mxu0  ;;  %v294_v58 = vsel %vm198_vm2, %v240_v51, -inf }
 0x376   :  { %v291_v59 = vpop.f32.mrb[6].mxu0  ;;  %295 = vmax.xlane.f32.xlu1 %v294_v58 }
 0x377   :  { %v3076_v60 = vpop.f32.mrb[7].mxu0  ;;  %v297_v61 = vsel %vm198_vm2, %v289_v55, -inf }
 0x378   :  { %298 = vmax.xlane.f32.xlu0 %v297_v61 }
 0x387   :  { %367 = vrot.lane.b32.xlu1 %v3669_v43, %s3519_s0 }
 0x38b   :  { %417 = vrot.lane.b32.xlu1 %v3667_v40, %s3520_s19 }
 0x403   :  { %v296_v62 = vpop.xlane.xlu1 %295 }
 0x404   :  { %v300_v63 = vsub.f32 %v240_v51, %v296_v62 }
 0x405   :  { %v299_v0 = vpop.xlane.xlu0 %298 }
 0x406   :  { %v302_v1 = vmul.f32 1.442695, %v300_v63  ;;  %v301_v2 = vsub.f32 %v289_v55, %v299_v0 }
 0x407   :  { %v368_v3 = vpop.permute.xlu1 %367 }
 0x408   :  { %3402 = vpow2.f32 %v302_v1  ;;  %v304_v4 = vmul.f32 1.442695, %v301_v2  ;;  %v373_v5 = vsel %vm323_vm3, %v368_v3, 0 }
 0x409   :  { %3084 = vmatpush3.bf16.msra.mxu0 %v373_v5 }
 0x40a   :  { %3404 = vpow2.f32 %v304_v4  ;;  %3095 = vmatprep.subr.bf16.mxu0 %v3516_v16 }
 0x40b   :  { %v418_v10 = vpop.permute.xlu1 %417 }
 0x40c   :  { %v423_v22 = vsel %vm198_vm2, %v418_v10, 0 }
 0x412   :  { %v3403_v6 = vpop.eup %3402 }
 0x413   :  { %v306_v7 = vsel %vm198_vm2, %v3403_v6, 0.0 }
 0x414   :  { %v3405_v8 = vpop.eup %3404  ;;  %307 = vadd.xlane.f32.xlu0 %v306_v7 }
 0x415   :  { %v309_v9 = vsel %vm198_vm2, %v3405_v8, 0.0 }
 0x416   :  { %310 = vadd.xlane.f32.xlu1 %v309_v9 }
 0x427   :  { %467 = vrot.lane.b32.xlu1 %v3669_v43, %s3520_s19 }
 0x42a   :  { %318 = vrot.lane.b32.xlu0 %v3667_v40, %s3519_s0 }
 0x42b   :  { %465 = vrot.lane.b32.xlu1 %v3669_v43, %s3521_s1 }
 0x42e   :  { %415 = vrot.lane.b32.xlu0 %v3667_v40, %s3521_s1 }
 0x4a1   :  { %v308_v11 = vpop.xlane.xlu0 %307 }
 0x4a2   :  { %3406 = vrcp.f32 %v308_v11 }
 0x4a3   :  { %v311_v12 = vpop.xlane.xlu1 %310 }
 0x4a4   :  { %3408 = vrcp.f32 %v311_v12 }
 0x4a5   :  { %v319_v13 = vpop.permute.xlu0 %318 }
 0x4a6   :  { %v325_v14 = vsel %vm323_vm3, %v319_v13, 0 }
 0x4a7   :  { %3078 = vmatpush3.bf16.msra.mxu1 %v325_v14  ;;  %v468_v21 = vpop.permute.xlu1 %467 }
 0x4a8   :  { %3089 = vmatprep.subr.bf16.mxu1 %v3516_v16  ;;  %v473_v24 = vsel %vm198_vm2, %v468_v21, 0 }
 0x4a9   :  { %v416_v25 = vpop.permute.xlu0 %415 }
 0x4ab   :  { %v466_v26 = vpop.permute.xlu1 %465 }
 0x4ac   :  { %v3407_v15 = vpop.eup %3406 }
 0x4ad   :  { %v314_v17 = vmul.f32 %v3407_v15, %v3403_v6 }
 0x4ae   :  { %v3409_v18 = vpop.eup %3408 }
 0x4af   :  { %v315_v19 = vmul.f32 %v3409_v18, %v3405_v8  ;;  %v316_v20 = vpack.c.bf16 %v314_v17, %v314_v17 }
 0x4b1   :  { %3080 = vmatmul.mubr.msk.bf16.vlgmr.msra.gmra.mrb[4].mxu1 %vm198_vm2, %v316_v20  ;;  %v317_v23 = vpack.c.bf16 %v315_v19, %v315_v19 }
 0x4b2   :  { %3090 = vmatpush3.bf16.xpose.msra.mxu1 %v423_v22  ;;  %3091 = vmatprep.mubr.msk.bf16.mxu1 %vm3517_vm1, %v3516_v16 }
 0x4b3   :  { %3086 = vmatmul.mubr.msk.bf16.vlgmr.msra.gmra.mrb[8].mxu0 %vm198_vm2, %v317_v23  ;;  %3101 = vmatprep.subr.bf16.mxu1 %v3516_v16 }
 0x4b4   :  { %3096 = vmatpush3.bf16.xpose.msra.mxu0 %v473_v24  ;;  %3097 = vmatprep.mubr.msk.bf16.mxu0 %vm3517_vm1, %v3516_v16 }
 0x4b5   :  { %3107 = vmatprep.subr.bf16.mxu0 %v3516_v16 }
 0x4b9   :  { %3092 = vmatmul.mubr.msk.bf16.vlgmr.msra.gmra.mrb[8].mxu1 %vm198_vm2, %v416_v25 }
 0x4ba   :  { %3103 = vmatprep.mubr.msk.bf16.mxu1 %vm3517_vm1, %v3516_v16 }
 0x4bb   :  { %3098 = vmatmul.mubr.msk.bf16.vlgmr.msra.gmra.mrb[12].mxu0 %vm198_vm2, %v466_v26 }
 0x4bc   :  { %3109 = vmatprep.mubr.msk.bf16.mxu0 %vm3517_vm1, %v3516_v16 }
 0x584   :  { %v3735_v27 = vpop.f32.mrb[4].mxu1 }
 0x585   :  { %v3081_v28 = vpop.f32.mrb[5].mxu1 }
 0x586   :  { %v364_v29 = vpop.f32.mrb[6].mxu1  ;;  %v3737_v30 = vpop.f32.mrb[8].mxu0 }
 0x587   :  { %v3082_v31 = vpop.f32.mrb[7].mxu1  ;;  %v3087_v34 = vpop.f32.mrb[9].mxu0 }
 0x588   :  { %v412_v35 = vpop.f32.mrb[10].mxu0 }
 0x589   :  { %v3088_v36 = vpop.f32.mrb[11].mxu0 }
 0x58c   :  { %v459_v37 = vpop.f32.mrb[8].mxu1 }
 0x58d   :  { %v460_v38 = vadd.f32 %v3690_v48, %v459_v37  ;;  %v3093_v39 = vpop.f32.mrb[9].mxu1 }
 0x58e   :  { %v462_v41 = vpop.f32.mrb[10].mxu1  ;;  %v509_v42 = vpop.f32.mrb[12].mxu0 }
 0x58f   :  { %v510_v44 = vadd.f32 %v3695_v50, %v509_v42  ;;  %v3094_v45 = vpop.f32.mrb[11].mxu1  ;;  %v3099_v46 = vpop.f32.mrb[13].mxu0  ;;  %v515_v47 = vsel %vm198_vm2, %v460_v38, -inf }
 0x590   :  { %516 = vmax.xlane.f32.xlu0 %v515_v47  ;;  %v512_v49 = vpop.f32.mrb[14].mxu0 }
 0x591   :  { %v3100_v51 = vpop.f32.mrb[15].mxu0  ;;  %v518_v52 = vsel %vm198_vm2, %v510_v44, -inf }
 0x592   :  { %519 = vmax.xlane.f32.xlu1 %v518_v52 }
 0x5a3   :  { %587 = vrot.lane.b32.xlu1 %v3669_v43, %s3522_s20 }
 0x5a7   :  { %637 = vrot.lane.b32.xlu1 %v3667_v40, %s3523_s21 }
 0x5ab   :  { %687 = vrot.lane.b32.xlu1 %v3669_v43, %s3523_s21 }
 0x5af   :  { %685 = vrot.lane.b32.xlu1 %v3669_v43, %s3524_s22 }
 0x61d   :  { %v517_v53 = vpop.xlane.xlu0 %516 }
 0x61e   :  { %v521_v54 = vsub.f32 %v460_v38, %v517_v53 }
 0x61f   :  { %v520_v55 = vpop.xlane.xlu1 %519 }
 0x620   :  { %v523_v56 = vmul.f32 1.442695, %v521_v54  ;;  %v522_v57 = vsub.f32 %v510_v44, %v520_v55 }
 0x622   :  { %3410 = vpow2.f32 %v523_v56  ;;  %v525_v58 = vmul.f32 1.442695, %v522_v57 }
 0x623   :  { %v588_v59 = vpop.permute.xlu1 %587 }
 0x624   :  { %3412 = vpow2.f32 %v525_v58  ;;  %v593_v60 = vsel %vm323_vm3, %v588_v59, 0 }
 0x625   :  { %3108 = vmatpush3.bf16.msra.mxu0 %v593_v60 }
 0x626   :  { %3119 = vmatprep.subr.bf16.mxu0 %v3516_v16 }
 0x627   :  { %v638_v6 = vpop.permute.xlu1 %637 }
 0x628   :  { %v643_v12 = vsel %vm198_vm2, %v638_v6, 0 }
 0x62b   :  { %v688_v11 = vpop.permute.xlu1 %687 }
 0x62c   :  { %v3411_v61 = vpop.eup %3410  ;;  %v693_v14 = vsel %vm198_vm2, %v688_v11, 0 }
 0x62d   :  { %v527_v62 = vsel %vm198_vm2, %v3411_v61, 0.0 }
 0x62e   :  { %v3413_v63 = vpop.eup %3412  ;;  %528 = vadd.xlane.f32.xlu0 %v527_v62 }
 0x62f   :  { %v530_v0 = vsel %vm198_vm2, %v3413_v63, 0.0  ;;  %v686_v17 = vpop.permute.xlu1 %685 }
 0x632   :  { %531 = vadd.xlane.f32.xlu0 %v530_v0 }
 0x648   :  { %539 = vrot.lane.b32.xlu0 %v3667_v40, %s3522_s20 }
 0x64c   :  { %635 = vrot.lane.b32.xlu0 %v3667_v40, %s3524_s22 }
 0x6bb   :  { %v529_v1 = vpop.xlane.xlu0 %528 }
 0x6bc   :  { %3414 = vrcp.f32 %v529_v1 }
 0x6bf   :  { %v532_v2 = vpop.xlane.xlu0 %531 }
 0x6c0   :  { %3416 = vrcp.f32 %v532_v2 }
 0x6c3   :  { %v540_v3 = vpop.permute.xlu0 %539 }
 0x6c4   :  { %v545_v4 = vsel %vm323_vm3, %v540_v3, 0 }
 0x6c5   :  { %3102 = vmatpush3.bf16.msra.mxu1 %v545_v4 }
 0x6c6   :  { %v3415_v5 = vpop.eup %3414  ;;  %3113 = vmatprep.subr.bf16.mxu1 %v3516_v16 }
 0x6c7   :  { %v535_v7 = vmul.f32 %v3415_v5, %v3411_v61  ;;  %v636_v15 = vpop.permute.xlu0 %635 }
 0x6c9   :  { %v537_v8 = vpack.c.bf16 %v535_v7, %v535_v7 }
 0x6ca   :  { %v3417_v9 = vpop.eup %3416 }
 0x6cb   :  { %v536_v10 = vmul.f32 %v3417_v9, %v3413_v63  ;;  %3104 = vmatmul.mubr.msk.bf16.vlgmr.msra.gmra.mrb[12].mxu1 %vm198_vm2, %v537_v8 }
 0x6cc   :  { %3115 = vmatprep.mubr.msk.bf16.mxu1 %vm3517_vm1, %v3516_v16 }
 0x6cd   :  { %v538_v13 = vpack.c.bf16 %v536_v10, %v536_v10 }
 0x6ce   :  { %3114 = vmatpush3.bf16.xpose.msra.mxu1 %v643_v12 }
 0x6cf   :  { %3110 = vmatmul.mubr.msk.bf16.vlgmr.msra.gmra.mrb[16].mxu0 %vm198_vm2, %v538_v13  ;;  %3125 = vmatprep.subr.bf16.mxu1 %v3516_v16 }
 0x6d0   :  { %3120 = vmatpush3.bf16.xpose.msra.mxu0 %v693_v14  ;;  %3121 = vmatprep.mubr.msk.bf16.mxu0 %vm3517_vm1, %v3516_v16 }
 0x6d1   :  { %3131 = vmatprep.subr.bf16.mxu0 %v3516_v16 }
 0x6d5   :  { %3116 = vmatmul.mubr.msk.bf16.vlgmr.msra.gmra.mrb[16].mxu1 %vm198_vm2, %v636_v15 }
 0x6d6   :  { %3127 = vmatprep.mubr.msk.bf16.mxu1 %vm3517_vm1, %v3516_v16 }
 0x6d7   :  { %3122 = vmatmul.mubr.msk.bf16.vlgmr.msra.gmra.mrb[20].mxu0 %vm198_vm2, %v686_v17 }
 0x6d8   :  { %3133 = vmatprep.mubr.msk.bf16.mxu0 %vm3517_vm1, %v3516_v16 }
 0x79e   :  { %v3777_v18 = vpop.f32.mrb[12].mxu1 }
 0x79f   :  { %v3105_v19 = vpop.f32.mrb[13].mxu1 }
 0x7a0   :  { %v584_v20 = vpop.f32.mrb[14].mxu1 }
 0x7a1   :  { %v3106_v21 = vpop.f32.mrb[15].mxu1 }
 0x7a2   :  { %v3779_v22 = vpop.f32.mrb[16].mxu0 }
 0x7a3   :  { %v3346_v23 = vpack.i.bf16 %v3779_v22, %v3777_v18  ;;  %v3111_v24 = vpop.f32.mrb[17].mxu0 }
 0x7a4   :  { %v632_v25 = vpop.f32.mrb[18].mxu0 }
 0x7a5   :  { %v3112_v26 = vpop.f32.mrb[19].mxu0 }
 0x7a8   :  { %v679_v28 = vpop.f32.mrb[16].mxu1 }
 0x7a9   :  { %v680_v29 = vadd.f32 %v3690_v48, %v679_v28  ;;  %v3117_v31 = vpop.f32.mrb[17].mxu1 }
 0x7aa   :  { %v682_v34 = vpop.f32.mrb[18].mxu1  ;;  %v729_v35 = vpop.f32.mrb[20].mxu0 }
 0x7ab   :  { %v730_v36 = vadd.f32 %v3695_v50, %v729_v35  ;;  %v3118_v37 = vpop.f32.mrb[19].mxu1  ;;  %v3123_v38 = vpop.f32.mrb[21].mxu0  ;;  %v735_v39 = vsel %vm198_vm2, %v680_v29, -inf }
 0x7ac   :  { %736 = vmax.xlane.f32.xlu0 %v735_v39  ;;  %v732_v41 = vpop.f32.mrb[22].mxu0 }
 0x7ad   :  { %v3124_v42 = vpop.f32.mrb[23].mxu0  ;;  %v738_v44 = vsel %vm198_vm2, %v730_v36, -inf }
 0x7ae   :  { %739 = vmax.xlane.f32.xlu1 %v738_v44 }
 0x7bf   :  { %807 = vrot.lane.b32.xlu1 %v3669_v43, %s4256_s2 }
 0x7c3   :  { %857 = vrot.lane.b32.xlu1 %v3667_v40, %s4254_s23 }
 0x7c7   :  { %907 = vrot.lane.b32.xlu1 %v3669_v43, %s4254_s23 }
 0x7cb   :  { %905 = vrot.lane.b32.xlu1 %v3669_v43, %s4252_s24 }
 0x839   :  { %v737_v45 = vpop.xlane.xlu0 %736 }
 0x83a   :  { %v741_v46 = vsub.f32 %v680_v29, %v737_v45 }
 0x83b   :  { %v740_v47 = vpop.xlane.xlu1 %739 }
 0x83c   :  { %v743_v49 = vmul.f32 1.442695, %v741_v46  ;;  %v742_v51 = vsub.f32 %v730_v36, %v740_v47 }
 0x83e   :  { %3418 = vpow2.f32 %v743_v49  ;;  %v745_v52 = vmul.f32 1.442695, %v742_v51 }
 0x83f   :  { %v808_v53 = vpop.permute.xlu1 %807 }
 0x840   :  { %3420 = vpow2.f32 %v745_v52  ;;  %v813_v54 = vsel %vm323_vm3, %v808_v53, 0 }
 0x841   :  { %3132 = vmatpush3.bf16.msra.mxu0 %v813_v54 }
 0x842   :  { %3143 = vmatprep.subr.bf16.mxu0 %v3516_v16 }
 0x843   :  { %v858_v0 = vpop.permute.xlu1 %857 }
 0x844   :  { %v863_v6 = vsel %vm198_vm2, %v858_v0, 0 }
 0x847   :  { %v908_v5 = vpop.permute.xlu1 %907 }
 0x848   :  { %v3419_v55 = vpop.eup %3418  ;;  %v913_v8 = vsel %vm198_vm2, %v908_v5, 0 }
 0x849   :  { %v747_v56 = vsel %vm198_vm2, %v3419_v55, 0.0 }
 0x84a   :  { %v3421_v57 = vpop.eup %3420  ;;  %748 = vadd.xlane.f32.xlu0 %v747_v56 }
 0x84b   :  { %v750_v58 = vsel %vm198_vm2, %v3421_v57, 0.0  ;;  %v906_v10 = vpop.permute.xlu1 %905 }
 0x84e   :  { %751 = vadd.xlane.f32.xlu0 %v750_v58 }
 0x864   :  { %759 = vrot.lane.b32.xlu0 %v3667_v40, %s4256_s2 }
 0x868   :  { %855 = vrot.lane.b32.xlu0 %v3667_v40, %s4252_s24 }
 0x8d7   :  { %v749_v59 = vpop.xlane.xlu0 %748 }
 0x8d8   :  { %3422 = vrcp.f32 %v749_v59  ;;  %v3378_v59 = vld [vmem:[%s4233_s6] sm:$0xff]  }
 0x8db   :  { %v752_v60 = vpop.xlane.xlu0 %751 }
 0x8dc   :  { %3424 = vrcp.f32 %v752_v60  ;;  %v3379_v60 = vld [vmem:[%s4233_s6 + $0x8] sm:$0xff]  }
 0x8df   :  { %v760_v61 = vpop.permute.xlu0 %759 }
 0x8e0   :  { %v765_v62 = vsel %vm323_vm3, %v760_v61, 0 }
 0x8e1   :  { %3126 = vmatpush3.bf16.msra.mxu1 %v765_v62 }
 0x8e2   :  { %v3423_v63 = vpop.eup %3422  ;;  %3137 = vmatprep.subr.bf16.mxu1 %v3516_v16 }
 0x8e3   :  { %v755_v1 = vmul.f32 %v3423_v63, %v3419_v55  ;;  %v856_v9 = vpop.permute.xlu0 %855 }
 0x8e5   :  { %v757_v2 = vpack.c.bf16 %v755_v1, %v755_v1 }
 0x8e6   :  { %v3425_v3 = vpop.eup %3424 }
 0x8e7   :  { %v756_v4 = vmul.f32 %v3425_v3, %v3421_v57  ;;  %3128 = vmatmul.mubr.msk.bf16.vlgmr.msra.gmra.mrb[20].mxu1 %vm198_vm2, %v757_v2 }
 0x8e8   :  { %3139 = vmatprep.mubr.msk.bf16.mxu1 %vm3517_vm1, %v3516_v16 }
 0x8e9   :  { %v758_v7 = vpack.c.bf16 %v756_v4, %v756_v4 }
 0x8ea   :  { %3138 = vmatpush3.bf16.xpose.msra.mxu1 %v863_v6 }
 0x8eb   :  { %3134 = vmatmul.mubr.msk.bf16.vlgmr.msra.gmra.mrb[24].mxu0 %vm198_vm2, %v758_v7  ;;  %3149 = vmatprep.subr.bf16.mxu1 %v3516_v16 }
 0x8ec   :  { %3144 = vmatpush3.bf16.xpose.msra.mxu0 %v913_v8  ;;  %3145 = vmatprep.mubr.msk.bf16.mxu0 %vm3517_vm1, %v3516_v16 }
 0x8ed   :  { %3155 = vmatprep.subr.bf16.mxu0 %v3516_v16 }
 0x8f1   :  { %3140 = vmatmul.mubr.msk.bf16.vlgmr.msra.gmra.mrb[24].mxu1 %vm198_vm2, %v856_v9 }
 0x8f2   :  { %3151 = vmatprep.mubr.msk.bf16.mxu1 %vm3517_vm1, %v3516_v16 }
 0x8f3   :  { %3146 = vmatmul.mubr.msk.bf16.vlgmr.msra.gmra.mrb[28].mxu0 %vm198_vm2, %v906_v10 }
 0x8f4   :  { %3157 = vmatprep.mubr.msk.bf16.mxu0 %vm3517_vm1, %v3516_v16 }
 0x9ba   :  { %v801_v11 = vpop.f32.mrb[20].mxu1 }
 0x9bb   :  { %v3129_v12 = vpop.f32.mrb[21].mxu1 }
 0x9bc   :  { %v804_v13 = vpop.f32.mrb[22].mxu1 }
 0x9bd   :  { %v3130_v14 = vpop.f32.mrb[23].mxu1 }
 0x9be   :  { %v849_v15 = vpop.f32.mrb[24].mxu0 }
 0x9bf   :  { %v3351_v17 = vpack.i.bf16 %v849_v15, %v801_v11  ;;  %v3135_v19 = vpop.f32.mrb[25].mxu0 }
 0x9c0   :  { %v852_v20 = vpop.f32.mrb[26].mxu0 }
 0x9c1   :  { %v3136_v21 = vpop.f32.mrb[27].mxu0 }
 0x9c4   :  { %v899_v24 = vpop.f32.mrb[24].mxu1 }
 0x9c5   :  { %v900_v25 = vadd.f32 %v3690_v48, %v899_v24  ;;  %v3141_v26 = vpop.f32.mrb[25].mxu1 }
 0x9c6   :  { %v902_v28 = vpop.f32.mrb[26].mxu1  ;;  %v949_v29 = vpop.f32.mrb[28].mxu0 }
 0x9c7   :  { %v950_v31 = vadd.f32 %v3695_v50, %v949_v29  ;;  %v3142_v34 = vpop.f32.mrb[27].mxu1  ;;  %v3147_v35 = vpop.f32.mrb[29].mxu0  ;;  %v955_v36 = vsel %vm198_vm2, %v900_v25, -inf }
 0x9c8   :  { %956 = vmax.xlane.f32.xlu0 %v955_v36  ;;  %v952_v37 = vpop.f32.mrb[30].mxu0 }
 0x9c9   :  { %v3148_v38 = vpop.f32.mrb[31].mxu0  ;;  %v958_v39 = vsel %vm198_vm2, %v950_v31, -inf }
 0x9ca   :  { %959 = vmax.xlane.f32.xlu1 %v958_v39 }
 0x9db   :  { %1027 = vrot.lane.b32.xlu1 %v3669_v43, %s4250_s25 }
 0x9df   :  { %3347 = vrot.lane.b32.xlu1 %v3346_v23, %s4248_s26 }
 0x9e3   :  { %3352 = vrot.lane.b32.xlu1 %v3351_v17, %s4247_s27 }
 0xa55   :  { %v957_v48 = vpop.xlane.xlu0 %956 }
 0xa56   :  { %v961_v50 = vsub.f32 %v900_v25, %v957_v48 }
 0xa57   :  { %v960_v41 = vpop.xlane.xlu1 %959 }
 0xa58   :  { %v963_v42 = vmul.f32 1.442695, %v961_v50  ;;  %v962_v44 = vsub.f32 %v950_v31, %v960_v41 }
 0xa5a   :  { %3426 = vpow2.f32 %v963_v42  ;;  %v965_v45 = vmul.f32 1.442695, %v962_v44 }
 0xa5b   :  { %v1028_v46 = vpop.permute.xlu1 %1027 }
 0xa5c   :  { %3428 = vpow2.f32 %v965_v45  ;;  %v1033_v43 = vsel %vm323_vm3, %v1028_v46, 0 }
 0xa5d   :  { %3156 = vmatpush3.bf16.msra.mxu0 %v1033_v43 }
 0xa5e   :  { %3169 = vmatprep.subr.bf16.mxu0 %v3516_v16 }
 0xa5f   :  { %v3348_v6 = vpop.permute.xlu1 %3347 }
 0xa60   :  { %v3350_v8 = vunpack.i.h.bf16 %v3348_v6  ;;  %v3349_v9 = vunpack.i.l.bf16 %v3348_v6 }
 0xa62   :  { %v1100_v13 = vsel %vm198_vm2, %v3737_v30, %v3350_v8  ;;  %v1099_v14 = vsel %vm198_vm2, %v3735_v27, %v3349_v9  ;;  %v2870_v27 = vld [vmem:[%s4234_s7] ss:$0 sm:$0xff] }
 0xa63   :  { %v3353_v7 = vpop.permute.xlu1 %3352 }
 0xa64   :  { %v3427_v47 = vpop.eup %3426  ;;  %v3355_v10 = vunpack.i.h.bf16 %v3353_v7  ;;  %v3354_v11 = vunpack.i.l.bf16 %v3353_v7 }
 0xa65   :  { %v967_v18 = vsel %vm198_vm2, %v3427_v47, 0.0 }
 0xa66   :  { %v3429_v22 = vpop.eup %3428  ;;  %968 = vadd.xlane.f32.xlu0 %v967_v18  ;;  %v1102_v19 = vsel %vm1101_vm4, %v1099_v14, %v3354_v11  ;;  %v1103_v20 = vsel %vm1101_vm4, %v1100_v13, %v3355_v10 }
 0xa67   :  { %v970_v23 = vsel %vm198_vm2, %v3429_v22, 0.0 }
 0xa6a   :  { %971 = vadd.xlane.f32.xlu0 %v970_v23 }
 0xa80   :  { %979 = vrot.lane.b32.xlu0 %v3667_v40, %s4250_s25 }
 0xaf3   :  { %v969_v49 = vpop.xlane.xlu0 %968 }
 0xaf4   :  { %3430 = vrcp.f32 %v969_v49 }
 0xaf7   :  { %v972_v51 = vpop.xlane.xlu0 %971 }
 0xaf8   :  { %3432 = vrcp.f32 %v972_v51 }
 0xafb   :  { %v980_v52 = vpop.permute.xlu0 %979 }
 0xafc   :  { %v985_v53 = vsel %vm323_vm3, %v980_v52, 0 }
 0xafd   :  { %3150 = vmatpush3.bf16.msra.mxu1 %v985_v53 }
 0xafe   :  { %v3431_v54 = vpop.eup %3430  ;;  %3161 = vmatprep.subr.bf16.mxu1 %v3516_v16 }
 0xaff   :  { %v975_v55 = vmul.f32 %v3431_v54, %v3427_v47  ;;  %v3381_v47 = vld [vmem:[%s4237_s10 + $0x8] sm:$0xff]  }
 0xb01   :  { %v977_v56 = vpack.c.bf16 %v975_v55, %v975_v55  ;;  %v2874_v55 = vld [vmem:[%s4235_s8] ss:$0 sm:$0xff] }
 0xb02   :  { %v3433_v57 = vpop.eup %3432 }
 0xb03   :  { %v976_v58 = vmul.f32 %v3433_v57, %v3429_v22  ;;  %3152 = vmatmul.mubr.msk.bf16.vlgmr.msra.gmra.mrb[28].mxu1 %vm198_vm2, %v977_v56 }
 0xb04   :  { %3165 = vmatprep.mubr.msk.bf16.mxu1 %vm3517_vm1, %v3516_v16  ;;  %3162 = vmatpush3.bf16.msra.mxu1 %v3378_v59 }
 0xb05   :  { %v978_v40 = vpack.c.bf16 %v976_v58, %v976_v58  ;;  %3163 = vmatprep.subr.bf16.mxu1 %v3516_v16 }
 0xb07   :  { %3158 = vmatmul.mubr.msk.bf16.vlgmr.msra.gmra.mrb[32].mxu0 %vm198_vm2, %v978_v40  ;;  %v2875_v40 = vld [vmem:[%s4236_s9] ss:$0 sm:$0xff] }
 0xb08   :  { %3173 = vmatprep.mubr.msk.bf16.mxu0 %vm3517_vm1, %v3516_v16  ;;  %3164 = vmatpush3.bf16.msra.mxu1 %v3379_v60 }
 0xb09   :  { %3177 = vmatprep.subr.bf16.mxu1 %v3516_v16 }
 0xbd6   :  { %v1021_v61 = vpop.f32.mrb[28].mxu1 }
 0xbd7   :  { %v3153_v62 = vpop.f32.mrb[29].mxu1 }
 0xbd8   :  { %v1024_v63 = vpop.f32.mrb[30].mxu1 }
 0xbd9   :  { %v3154_v0 = vpop.f32.mrb[31].mxu1  ;;  %v3382_v63 = vld [vmem:[%s4239_s12] sm:$0xff]  }
 0xbda   :  { %v1069_v1 = vpop.f32.mrb[32].mxu0  ;;  %v3383_v0 = vld [vmem:[%s4239_s12 + $0x8] sm:$0xff]  }
 0xbdb   :  { %v3356_v2 = vpack.i.bf16 %v1069_v1, %v1021_v61  ;;  %v3159_v3 = vpop.f32.mrb[33].mxu0  ;;  %v3384_v1 = vld [vmem:[%s4239_s12 + $0x10] sm:$0xff]  }
 0xbdc   :  { %v1072_v4 = vpop.f32.mrb[34].mxu0  ;;  %v2876_v3 = vld [vmem:[%s4238_s11] ss:$0 sm:$0xff] }
 0xbdd   :  { %3357 = vrot.lane.b32.xlu0 %v3356_v2, %s4249_s29  ;;  %v3160_v5 = vpop.f32.mrb[35].mxu0  ;;  %v3385_v2 = vld [vmem:[%s4239_s12 + $0x18] sm:$0xff]  }
 0xc4f   :  { %v3358_v12 = vpop.permute.xlu0 %3357 }
 0xc50   :  { %v3360_v15 = vunpack.i.h.bf16 %v3358_v12  ;;  %v3359_v17 = vunpack.i.l.bf16 %v3358_v12 }
 0xc52   :  { %v1106_v21 = vsel %vm1104_vm5, %v1103_v20, %v3360_v15  ;;  %v1105_v24 = vsel %vm1104_vm5, %v1102_v19, %v3359_v17 }
 0xc53   :  { %v1107_v25 = vpack.c.bf16 %v1106_v21, %v1105_v24 }
 0xc55   :  { %3166 = vmatmul.mubr.msk.bf16.vlgmr.msra.gmra.mrb[32].mxu1 %vm69_vm0, %v1107_v25 }
 0xc56   :  { %3185 = vmatprep.mubr.msk.bf16.mxu1 %vm3517_vm1, %v3516_v16  ;;  %3178 = vmatpush3.bf16.msra.mxu1 %v3382_v63 }
 0xc57   :  { %3179 = vmatprep.subr.bf16.mxu1 %v3516_v16 }
 0xc5a   :  { %3180 = vmatpush3.bf16.msra.mxu1 %v3383_v0 }
 0xc5b   :  { %3181 = vmatprep.subr.bf16.mxu1 %v3516_v16 }
 0xc5e   :  { %3182 = vmatpush3.bf16.msra.mxu1 %v3384_v1  ;;  %v2887_v1 = vld [vmem:[%s4242_s15] ss:$0 sm:$0xff] }
 0xc5f   :  { %3183 = vmatprep.subr.bf16.mxu1 %v3516_v16 }
 0xc62   :  { %3184 = vmatpush3.bf16.msra.mxu1 %v3385_v2 }
 0xc63   :  { %3203 = vmatprep.subr.bf16.mxu1 %v3516_v16 }
 0xd28   :  { %v1168_v30 = vpop.f32.mrb[32].mxu1 }
 0xd29   :  { %v1169_v26 = vadd.f32 %v2870_v27, %v1168_v30  ;;  %v3167_v28 = vpop.f32.mrb[33].mxu1 }
 0xd2a   :  { %v1171_v29 = vpop.f32.mrb[34].mxu1 }
 0xd2b   :  { %v1172_v31 = vadd.f32 %v2870_v27, %v1171_v29  ;;  %v3168_v34 = vpop.f32.mrb[35].mxu1  ;;  %v1175_v35 = vadd.f32 %v1169_v26, %v3655_v32 }
 0xd2d   :  { %v1179_v36 = vsel %vm69_vm0, %v1175_v35, 0.0  ;;  %v1176_v37 = vadd.f32 %v1172_v31, %v3657_v33  ;;  %v3380_v33 = vld [vmem:[%s4237_s10] sm:$0xff]  }
 0xd2e   :  { %1180 = vadd.xlane.f32.xlu1 %v1179_v36  ;;  %3170 = vmatpush3.bf16.msra.mxu0 %v3380_v33 }
 0xd2f   :  { %v1182_v38 = vsel %vm69_vm0, %v1176_v37, 0.0  ;;  %3171 = vmatprep.subr.bf16.mxu0 %v3516_v16 }
 0xd30   :  { %1183 = vadd.xlane.f32.xlu0 %v1182_v38 }
 0xd32   :  { %3172 = vmatpush3.bf16.msra.mxu0 %v3381_v47 }
 0xd33   :  { %3189 = vmatprep.subr.bf16.mxu0 %v3516_v16 }
 0xdbb   :  { %v1181_v39 = vpop.xlane.xlu1 %1180 }
 0xdbc   :  { %v1185_v48 = vmul.f32 0.03125, %v1181_v39 }
 0xdbd   :  { %v1184_v50 = vpop.xlane.xlu0 %1183 }
 0xdbe   :  { %v1187_v41 = vsub.f32 %v1175_v35, %v1185_v48  ;;  %v1186_v42 = vmul.f32 0.03125, %v1184_v50  ;;  %v2880_v35 = vld [vmem:[%s4240_s13] ss:$0 sm:$0xff] }
 0xdc0   :  { %v1188_v44 = vsub.f32 %v1176_v37, %v1186_v42  ;;  %v1189_v45 = vmul.f32 %v1187_v41, %v1187_v41 }
 0xdc2   :  { %v1191_v46 = vsel %vm69_vm0, %v1189_v45, 0.0  ;;  %v1190_v43 = vmul.f32 %v1188_v44, %v1188_v44 }
 0xdc3   :  { %1192 = vadd.xlane.f32.xlu0 %v1191_v46 }
 0xdc4   :  { %v1194_v32 = vsel %vm69_vm0, %v1190_v43, 0.0 }
 0xdc7   :  { %1195 = vadd.xlane.f32.xlu0 %v1194_v32 }
 0xe50   :  { %v1193_v18 = vpop.xlane.xlu0 %1192 }
 0xe51   :  { %v1197_v22 = vmul.f32 0.03125, %v1193_v18 }
 0xe53   :  { %v1199_v23 = vadd.f32 1e-12, %v1197_v22 }
 0xe54   :  { %v1196_v49 = vpop.xlane.xlu0 %1195 }
 0xe55   :  { %3434 = vrsqrt.f32 %v1199_v23  ;;  %v1198_v51 = vmul.f32 0.03125, %v1196_v49 }
 0xe57   :  { %v1200_v52 = vadd.f32 1e-12, %v1198_v51 }
 0xe59   :  { %3436 = vrsqrt.f32 %v1200_v52  ;;  %v3386_v52 = vld [vmem:[%s4231_s4 + $0x10] sm:$0xff]  }
 0xe5f   :  { %v3435_v53 = vpop.eup %3434 }
 0xe60   :  { %v1203_v54 = vmul.f32 %v3435_v53, %v1187_v41  ;;  %v3387_v53 = vld [vmem:[%s4231_s4 + $0x18] sm:$0xff]   ;;  %s4270_s4 = smov 24  }
 0xe62   :  { %v1211_v57 = vmul.f32 %v2874_v55, %v1203_v54 }
 0xe63   :  { %v3437_v56 = vpop.eup %3436 }
 0xe64   :  { %v1204_v58 = vmul.f32 %v3437_v56, %v1188_v44  ;;  %v1219_v60 = vadd.f32 %v2875_v40, %v1211_v57 }
 0xe66   :  { %v1212_v59 = vmul.f32 %v2874_v55, %v1204_v58 }
 0xe68   :  { %v1220_v61 = vadd.f32 %v2875_v40, %v1212_v59 }
 0xe6a   :  { %v1221_v62 = vpack.c.bf16 %v1220_v61, %v1219_v60 }
 0xe6c   :  { %3174 = vmatmul.mubr.msk.bf16.vlgmr.msra.gmra.mrb[36].mxu0 %vm69_vm0, %v1221_v62 }
 0xe6d   :  { %3193 = vmatprep.mubr.msk.bf16.mxu0 %vm3517_vm1, %v3516_v16  ;;  %3190 = vmatpush3.bf16.msra.mxu0 %v3386_v52 }
 0xe6e   :  { %3191 = vmatprep.subr.bf16.mxu0 %v3516_v16 }
 0xe71   :  { %3192 = vmatpush3.bf16.msra.mxu0 %v3387_v53 }
 0xe72   :  { %3197 = vmatprep.subr.bf16.mxu0 %v3516_v16 }
 0xf3f   :  { %v1282_v4 = vpop.f32.mrb[36].mxu0 }
 0xf40   :  { %v1283_v5 = vadd.f32 %v2876_v3, %v1282_v4  ;;  %v3175_v6 = vpop.f32.mrb[37].mxu0 }
 0xf41   :  { %v1285_v7 = vpop.f32.mrb[38].mxu0  ;;  %v2893_v6 = vld [vmem:[%s4232_s5 + $0x1] ss:$0 sm:$0xff] }
 0xf42   :  { %v1291_v8 = vmul.f32 0.044715, %v1283_v5  ;;  %v1286_v9 = vadd.f32 %v2876_v3, %v1285_v7  ;;  %v3176_v10 = vpop.f32.mrb[39].mxu0  ;;  %v1289_v30 = vmul.f32 0.5, %v1283_v5 }
 0xf44   :  { %v1293_v11 = vmul.f32 %v1291_v8, %v1283_v5  ;;  %v1292_v12 = vmul.f32 0.044715, %v1286_v9  ;;  %v1290_v26 = vmul.f32 0.5, %v1286_v9 }
 0xf46   :  { %v1295_v13 = vmul.f32 %v1293_v11, %v1283_v5  ;;  %v1294_v14 = vmul.f32 %v1292_v12, %v1286_v9 }
 0xf48   :  { %v1297_v15 = vadd.f32 %v1295_v13, %v1283_v5  ;;  %v1296_v17 = vmul.f32 %v1294_v14, %v1286_v9 }
 0xf4a   :  { %v1299_v19 = vmul.f32 0.7978846, %v1297_v15  ;;  %v1298_v20 = vadd.f32 %v1296_v17, %v1286_v9 }
 0xf4c   :  { %3438 = vtanh.f32 %v1299_v19  ;;  %v1300_v21 = vmul.f32 0.7978846, %v1298_v20 }
 0xf4e   :  { %3440 = vtanh.f32 %v1300_v21 }
 0xf56   :  { %v3439_v24 = vpop.eup %3438 }
 0xf57   :  { %v1303_v25 = vadd.f32 1.0, %v3439_v24  ;;  %v3970_v24 = vld [vmem:[%s4263_s28] ss:$0 sm:$0xff] }
 0xf58   :  { %v3441_v27 = vpop.eup %3440 }
 0xf59   :  { %v1304_v28 = vadd.f32 1.0, %v3441_v27  ;;  %v1305_v29 = vmul.f32 %v1303_v25, %v1289_v30 }
 0xf5b   :  { %v1306_v31 = vmul.f32 %v1304_v28, %v1290_v26  ;;  %v3976_v28 = vld [vmem:[%s4263_s28 + $0x1] ss:$0 sm:$0xff]  ;;  %s4264_s28 = smov 48  }
 0xf5d   :  { %v1307_v34 = vpack.c.bf16 %v1306_v31, %v1305_v29 }
 0xf5f   :  { %3186 = vmatmul.mubr.msk.bf16.vlgmr.msra.gmra.mrb[36].mxu1 %vm1347_vm6, %v1307_v34 }
 0xf60   :  { %3205 = vmatprep.mubr.msk.bf16.mxu1 %vm3517_vm1, %v3516_v16 }
0x1032   :  { %v1385_v36 = vpop.f32.mrb[36].mxu1 }
0x1033   :  { %v1386_v37 = vadd.f32 %v2880_v35, %v1385_v36  ;;  %v3187_v38 = vpop.f32.mrb[37].mxu1 }
0x1034   :  { %v1388_v39 = vpop.f32.mrb[38].mxu1 }
0x1035   :  { %v1389_v48 = vadd.f32 %v2880_v35, %v1388_v39  ;;  %v3188_v50 = vpop.f32.mrb[39].mxu1  ;;  %v1392_v41 = vadd.f32 %v1386_v37, %v1219_v60  ;;  %v2886_v60 = vld [vmem:[%s4241_s14] ss:$0 sm:$0xff] }
0x1037   :  { %v1396_v42 = vsel %vm69_vm0, %v1392_v41, 0.0  ;;  %v1393_v44 = vadd.f32 %v1389_v48, %v1220_v61 }
0x1038   :  { %1397 = vadd.xlane.f32.xlu1 %v1396_v42 }
0x1039   :  { %v1399_v45 = vsel %vm69_vm0, %v1393_v44, 0.0 }
0x103a   :  { %1400 = vadd.xlane.f32.xlu0 %v1399_v45 }
0x10c5   :  { %v1398_v46 = vpop.xlane.xlu1 %1397 }
0x10c6   :  { %v1402_v43 = vmul.f32 0.03125, %v1398_v46 }
0x10c7   :  { %v1401_v32 = vpop.xlane.xlu0 %1400 }
0x10c8   :  { %v1404_v33 = vsub.f32 %v1392_v41, %v1402_v43  ;;  %v1403_v47 = vmul.f32 0.03125, %v1401_v32 }
0x10ca   :  { %v1405_v18 = vsub.f32 %v1393_v44, %v1403_v47  ;;  %v1406_v22 = vmul.f32 %v1404_v33, %v1404_v33 }
0x10cc   :  { %v1408_v23 = vsel %vm69_vm0, %v1406_v22, 0.0  ;;  %v1407_v49 = vmul.f32 %v1405_v18, %v1405_v18 }
0x10cd   :  { %1409 = vadd.xlane.f32.xlu1 %v1408_v23 }
0x10ce   :  { %v1411_v51 = vsel %vm69_vm0, %v1407_v49, 0.0 }
0x10cf   :  { %1412 = vadd.xlane.f32.xlu0 %v1411_v51 }
0x115a   :  { %v1410_v54 = vpop.xlane.xlu1 %1409 }
0x115b   :  { %v1414_v55 = vmul.f32 0.03125, %v1410_v54 }
0x115c   :  { %v1413_v56 = vpop.xlane.xlu0 %1412 }
0x115d   :  { %v1416_v57 = vadd.f32 1e-12, %v1414_v55  ;;  %v1415_v58 = vmul.f32 0.03125, %v1413_v56 }
0x115f   :  { %3442 = vrsqrt.f32 %v1416_v57  ;;  %v1417_v40 = vadd.f32 1e-12, %v1415_v58 }
0x1161   :  { %3444 = vrsqrt.f32 %v1417_v40 }
0x1169   :  { %v3443_v59 = vpop.eup %3442 }
0x116a   :  { %v1420_v61 = vmul.f32 %v3443_v59, %v1404_v33 }
0x116b   :  { %v3445_v62 = vpop.eup %3444 }
0x116c   :  { %v1428_v63 = vmul.f32 %v2886_v60, %v1420_v61  ;;  %v1421_v0 = vmul.f32 %v3445_v62, %v1405_v18 }
0x116e   :  { %v1429_v2 = vmul.f32 %v2886_v60, %v1421_v0  ;;  %v3935_v3 = vadd.f32 %v2887_v1, %v1428_v63 }
0x1170   :  { %v3937_v4 = vadd.f32 %v2887_v1, %v1429_v2 }
0x1172   :  { %v1438_v5 = vpack.c.bf16 %v3937_v4, %v3935_v3 }
0x1174   :  { %3194 = vmatmul.mubr.msk.bf16.vlgmr.msra.gmra.mrb[40].mxu0 %vm69_vm0, %v1438_v5 }
0x1175   :  { %3199 = vmatprep.mubr.msk.bf16.mxu0 %vm3517_vm1, %v3516_v16 }
0x1247   :  { %v1501_v7 = vpop.f32.mrb[40].mxu0 }
0x1248   :  { %v1502_v8 = vadd.f32 %v2893_v6, %v1501_v7  ;;  %v3195_v9 = vpop.f32.mrb[41].mxu0 }
0x1249   :  { %v1504_v10 = vpop.f32.mrb[42].mxu0 }
0x124a   :  { %v3947_v11 = vpack.c.bf16 %v1502_v8, %v1502_v8  ;;  %v1505_v12 = vadd.f32 %v2893_v6, %v1504_v10  ;;  %v3196_v13 = vpop.f32.mrb[43].mxu0 }
0x124c   :  { %v3949_v14 = vpack.c.bf16 %v1505_v12, %v1505_v12  ;;  %1511 = vrot.lane.b32.xlu1 %v3947_v11, %s3518_s3 }
0x124e   :  { %1560 = vrot.lane.b32.xlu0 %v3949_v14, %s3518_s3 }
0x12be   :  { %v1512_v15 = vpop.permute.xlu1 %1511 }
0x12bf   :  { %v1517_v17 = vsel %vm198_vm2, %v1512_v15, 0 }
0x12c0   :  { %3198 = vmatpush3.bf16.xpose.msra.mxu0 %v1517_v17  ;;  %v1561_v19 = vpop.permute.xlu0 %1560 }
0x12c1   :  { %v1566_v20 = vsel %vm198_vm2, %v1561_v19, 0  ;;  %3209 = vmatprep.subr.bf16.mxu0 %v3516_v16 }
0x12c2   :  { %3204 = vmatpush3.bf16.xpose.msra.mxu1 %v1566_v20 }
0x12c3   :  { %3215 = vmatprep.subr.bf16.mxu1 %v3516_v16 }
0x12c7   :  { %3200 = vmatmul.mubr.msk.bf16.vlgmr.msra.gmra.mrb[44].mxu0 %vm198_vm2, %v3947_v11 }
0x12c8   :  { %3211 = vmatprep.mubr.msk.bf16.mxu0 %vm3517_vm1, %v3516_v16 }
0x12c9   :  { %3206 = vmatmul.mubr.msk.bf16.vlgmr.msra.gmra.mrb[40].mxu1 %vm198_vm2, %v3949_v14 }
0x12ca   :  { %3217 = vmatprep.mubr.msk.bf16.mxu1 %vm3517_vm1, %v3516_v16 }
0x139a   :  { %v1553_v21 = vpop.f32.mrb[44].mxu0 }
0x139b   :  { %v1554_v25 = vadd.f32 %v3970_v24, %v1553_v21  ;;  %v3201_v27 = vpop.f32.mrb[45].mxu0 }
0x139c   :  { %v1556_v30 = vpop.f32.mrb[46].mxu0  ;;  %v1602_v26 = vpop.f32.mrb[40].mxu1 }
0x139d   :  { %v1603_v29 = vadd.f32 %v3976_v28, %v1602_v26  ;;  %v3202_v31 = vpop.f32.mrb[47].mxu0  ;;  %v3207_v34 = vpop.f32.mrb[41].mxu1  ;;  %v1608_v35 = vsel %vm198_vm2, %v1554_v25, -inf }
0x139e   :  { %v1605_v36 = vpop.f32.mrb[42].mxu1  ;;  %1609 = vmax.xlane.f32.xlu1 %v1608_v35 }
0x139f   :  { %v3208_v37 = vpop.f32.mrb[43].mxu1  ;;  %v1611_v38 = vsel %vm198_vm2, %v1603_v29, -inf }
0x13a0   :  { %1612 = vmax.xlane.f32.xlu0 %v1611_v38 }
0x13af   :  { %1632 = vrot.lane.b32.xlu1 %v3947_v11, %s3519_s0 }
0x142b   :  { %v1610_v39 = vpop.xlane.xlu1 %1609 }
0x142c   :  { %v1614_v48 = vsub.f32 %v1554_v25, %v1610_v39 }
0x142d   :  { %v1613_v50 = vpop.xlane.xlu0 %1612 }
0x142e   :  { %v1616_v41 = vmul.f32 1.442695, %v1614_v48  ;;  %v1615_v42 = vsub.f32 %v1603_v29, %v1613_v50 }
0x142f   :  { %v1633_v44 = vpop.permute.xlu1 %1632 }
0x1430   :  { %3446 = vpow2.f32 %v1616_v41  ;;  %v1618_v45 = vmul.f32 1.442695, %v1615_v42  ;;  %v1638_v46 = vsel %vm323_vm3, %v1633_v44, 0 }
0x1431   :  { %3210 = vmatpush3.bf16.msra.mxu0 %v1638_v46 }
0x1432   :  { %3448 = vpow2.f32 %v1618_v45  ;;  %3221 = vmatprep.subr.bf16.mxu0 %v3516_v16 }
0x143a   :  { %v3447_v43 = vpop.eup %3446 }
0x143b   :  { %v1620_v32 = vsel %vm198_vm2, %v3447_v43, 0.0 }
0x143c   :  { %v3449_v33 = vpop.eup %3448  ;;  %1621 = vadd.xlane.f32.xlu1 %v1620_v32 }
0x143d   :  { %v1623_v47 = vsel %vm198_vm2, %v3449_v33, 0.0 }
0x143e   :  { %1624 = vadd.xlane.f32.xlu0 %v1623_v47 }
0x144d   :  { %1730 = vrot.lane.b32.xlu1 %v3947_v11, %s3520_s19 }
0x1451   :  { %1780 = vrot.lane.b32.xlu1 %v3949_v14, %s3520_s19  ;;  %s4266_s19 = smov 104  }
0x1454   :  { %1680 = vrot.lane.b32.xlu0 %v3949_v14, %s3519_s0  ;;  %s4265_s0 = smov 72  }
0x1455   :  { %1728 = vrot.lane.b32.xlu1 %v3947_v11, %s3521_s1 }
0x1458   :  { %1778 = vrot.lane.b32.xlu0 %v3949_v14, %s3521_s1  ;;  %s4267_s1 = smov 40  }
0x14c9   :  { %v1622_v18 = vpop.xlane.xlu1 %1621 }
0x14ca   :  { %3450 = vrcp.f32 %v1622_v18 }
0x14cb   :  { %v1625_v22 = vpop.xlane.xlu0 %1624 }
0x14cc   :  { %3452 = vrcp.f32 %v1625_v22 }
0x14cd   :  { %v1731_v51 = vpop.permute.xlu1 %1730 }
0x14ce   :  { %v1736_v58 = vsel %vm198_vm2, %v1731_v51, 0 }
0x14cf   :  { %v1681_v23 = vpop.permute.xlu0 %1680 }
0x14d0   :  { %v1686_v49 = vsel %vm323_vm3, %v1681_v23, 0 }
0x14d1   :  { %3216 = vmatpush3.bf16.msra.mxu1 %v1686_v49  ;;  %v1781_v57 = vpop.permute.xlu1 %1780 }
0x14d2   :  { %3227 = vmatprep.subr.bf16.mxu1 %v3516_v16  ;;  %v1786_v59 = vsel %vm198_vm2, %v1781_v57, 0 }
0x14d3   :  { %v1779_v61 = vpop.permute.xlu0 %1778 }
0x14d4   :  { %v3451_v52 = vpop.eup %3450 }
0x14d5   :  { %v1628_v53 = vmul.f32 %v3451_v52, %v3447_v43  ;;  %v1729_v60 = vpop.permute.xlu1 %1728 }
0x14d6   :  { %v3453_v54 = vpop.eup %3452 }
0x14d7   :  { %v1629_v55 = vmul.f32 %v3453_v54, %v3449_v33  ;;  %v1630_v56 = vpack.c.bf16 %v1628_v53, %v1628_v53 }
0x14d9   :  { %3212 = vmatmul.mubr.msk.bf16.vlgmr.msra.gmra.mrb[48].mxu0 %vm198_vm2, %v1630_v56  ;;  %v1631_v40 = vpack.c.bf16 %v1629_v55, %v1629_v55 }
0x14da   :  { %3222 = vmatpush3.bf16.xpose.msra.mxu0 %v1736_v58  ;;  %3223 = vmatprep.mubr.msk.bf16.mxu0 %vm3517_vm1, %v3516_v16 }
0x14db   :  { %3218 = vmatmul.mubr.msk.bf16.vlgmr.msra.gmra.mrb[44].mxu1 %vm198_vm2, %v1631_v40  ;;  %3233 = vmatprep.subr.bf16.mxu0 %v3516_v16 }
0x14dc   :  { %3228 = vmatpush3.bf16.xpose.msra.mxu1 %v1786_v59  ;;  %3229 = vmatprep.mubr.msk.bf16.mxu1 %vm3517_vm1, %v3516_v16 }
0x14dd   :  { %3239 = vmatprep.subr.bf16.mxu1 %v3516_v16 }
0x14e1   :  { %3224 = vmatmul.mubr.msk.bf16.vlgmr.msra.gmra.mrb[52].mxu0 %vm198_vm2, %v1729_v60 }
0x14e2   :  { %3235 = vmatprep.mubr.msk.bf16.mxu0 %vm3517_vm1, %v3516_v16 }
0x14e3   :  { %3230 = vmatmul.mubr.msk.bf16.vlgmr.msra.gmra.mrb[48].mxu1 %vm198_vm2, %v1779_v61 }
0x14e4   :  { %3241 = vmatprep.mubr.msk.bf16.mxu1 %vm3517_vm1, %v3516_v16 }
0x15ac   :  { %v4015_v62 = vpop.f32.mrb[48].mxu0 }
0x15ad   :  { %v3213_v63 = vpop.f32.mrb[49].mxu0 }
0x15ae   :  { %v1677_v0 = vpop.f32.mrb[50].mxu0  ;;  %v4017_v1 = vpop.f32.mrb[44].mxu1 }
0x15af   :  { %v3214_v2 = vpop.f32.mrb[51].mxu0  ;;  %v3219_v5 = vpop.f32.mrb[45].mxu1 }
0x15b0   :  { %v1725_v6 = vpop.f32.mrb[46].mxu1 }
0x15b1   :  { %v3220_v7 = vpop.f32.mrb[47].mxu1 }
0x15b4   :  { %v1772_v8 = vpop.f32.mrb[52].mxu0 }
0x15b5   :  { %v1773_v9 = vadd.f32 %v3970_v24, %v1772_v8  ;;  %v3225_v10 = vpop.f32.mrb[53].mxu0 }
0x15b6   :  { %v1775_v12 = vpop.f32.mrb[54].mxu0  ;;  %v1822_v13 = vpop.f32.mrb[48].mxu1 }
0x15b7   :  { %v1823_v15 = vadd.f32 %v3976_v28, %v1822_v13  ;;  %v3226_v17 = vpop.f32.mrb[55].mxu0  ;;  %v3231_v19 = vpop.f32.mrb[49].mxu1  ;;  %v1828_v20 = vsel %vm198_vm2, %v1773_v9, -inf }
0x15b8   :  { %v1825_v21 = vpop.f32.mrb[50].mxu1  ;;  %1829 = vmax.xlane.f32.xlu1 %v1828_v20 }
0x15b9   :  { %v3232_v25 = vpop.f32.mrb[51].mxu1  ;;  %v1831_v27 = vsel %vm198_vm2, %v1823_v15, -inf }
0x15ba   :  { %1832 = vmax.xlane.f32.xlu0 %v1831_v27 }
0x15c9   :  { %1852 = vrot.lane.b32.xlu1 %v3947_v11, %s3522_s20 }
0x15cd   :  { %1950 = vrot.lane.b32.xlu1 %v3947_v11, %s3523_s21 }
0x15d1   :  { %2000 = vrot.lane.b32.xlu1 %v3949_v14, %s3523_s21  ;;  %s4269_s21 = smov 16  }
0x15d5   :  { %1948 = vrot.lane.b32.xlu1 %v3947_v11, %s3524_s22 }
0x1645   :  { %v1830_v30 = vpop.xlane.xlu1 %1829 }
0x1646   :  { %v1834_v26 = vsub.f32 %v1773_v9, %v1830_v30 }
0x1647   :  { %v1833_v29 = vpop.xlane.xlu0 %1832 }
0x1648   :  { %v1836_v31 = vmul.f32 1.442695, %v1834_v26  ;;  %v1835_v34 = vsub.f32 %v1823_v15, %v1833_v29 }
0x1649   :  { %v1853_v35 = vpop.permute.xlu1 %1852 }
0x164a   :  { %3454 = vpow2.f32 %v1836_v31  ;;  %v1838_v36 = vmul.f32 1.442695, %v1835_v34  ;;  %v1858_v37 = vsel %vm323_vm3, %v1853_v35, 0 }
0x164b   :  { %3234 = vmatpush3.bf16.msra.mxu0 %v1858_v37 }
0x164c   :  { %3456 = vpow2.f32 %v1838_v36  ;;  %3245 = vmatprep.subr.bf16.mxu0 %v3516_v16 }
0x164d   :  { %v1951_v43 = vpop.permute.xlu1 %1950 }
0x164e   :  { %v1956_v18 = vsel %vm198_vm2, %v1951_v43, 0 }
0x1651   :  { %v2001_v23 = vpop.permute.xlu1 %2000 }
0x1652   :  { %v2006_v51 = vsel %vm198_vm2, %v2001_v23, 0 }
0x1654   :  { %v3455_v38 = vpop.eup %3454 }
0x1655   :  { %v1840_v39 = vsel %vm198_vm2, %v3455_v38, 0.0  ;;  %v1949_v52 = vpop.permute.xlu1 %1948 }
0x1656   :  { %v3457_v48 = vpop.eup %3456  ;;  %1841 = vadd.xlane.f32.xlu0 %v1840_v39 }
0x1657   :  { %v1843_v50 = vsel %vm198_vm2, %v3457_v48, 0.0 }
0x165a   :  { %1844 = vadd.xlane.f32.xlu0 %v1843_v50 }
0x1670   :  { %1900 = vrot.lane.b32.xlu0 %v3949_v14, %s3522_s20  ;;  %s4268_s20 = smov 8  }
0x1674   :  { %1998 = vrot.lane.b32.xlu0 %v3949_v14, %s3524_s22 }
0x16e3   :  { %v1842_v41 = vpop.xlane.xlu0 %1841 }
0x16e4   :  { %3458 = vrcp.f32 %v1842_v41 }
0x16e7   :  { %v1845_v42 = vpop.xlane.xlu0 %1844 }
0x16e8   :  { %3460 = vrcp.f32 %v1845_v42 }
0x16eb   :  { %v1901_v44 = vpop.permute.xlu0 %1900 }
0x16ec   :  { %v1906_v45 = vsel %vm323_vm3, %v1901_v44, 0 }
0x16ed   :  { %3240 = vmatpush3.bf16.msra.mxu1 %v1906_v45 }
0x16ee   :  { %v3459_v46 = vpop.eup %3458  ;;  %3251 = vmatprep.subr.bf16.mxu1 %v3516_v16 }
0x16ef   :  { %v1848_v32 = vmul.f32 %v3459_v46, %v3455_v38  ;;  %v1999_v53 = vpop.permute.xlu0 %1998 }
0x16f1   :  { %v1850_v33 = vpack.c.bf16 %v1848_v32, %v1848_v32 }
0x16f2   :  { %v3461_v47 = vpop.eup %3460 }
0x16f3   :  { %v1849_v22 = vmul.f32 %v3461_v47, %v3457_v48  ;;  %3236 = vmatmul.mubr.msk.bf16.vlgmr.msra.gmra.mrb[56].mxu0 %vm198_vm2, %v1850_v33 }
0x16f4   :  { %3246 = vmatpush3.bf16.xpose.msra.mxu0 %v1956_v18  ;;  %3247 = vmatprep.mubr.msk.bf16.mxu0 %vm3517_vm1, %v3516_v16 }
0x16f5   :  { %v1851_v49 = vpack.c.bf16 %v1849_v22, %v1849_v22  ;;  %3257 = vmatprep.subr.bf16.mxu0 %v3516_v16 }
0x16f7   :  { %3242 = vmatmul.mubr.msk.bf16.vlgmr.msra.gmra.mrb[52].mxu1 %vm198_vm2, %v1851_v49 }
0x16f8   :  { %3252 = vmatpush3.bf16.xpose.msra.mxu1 %v2006_v51  ;;  %3253 = vmatprep.mubr.msk.bf16.mxu1 %vm3517_vm1, %v3516_v16 }
0x16f9   :  { %3263 = vmatprep.subr.bf16.mxu1 %v3516_v16 }
0x16fb   :  { %3248 = vmatmul.mubr.msk.bf16.vlgmr.msra.gmra.mrb[60].mxu0 %vm198_vm2, %v1949_v52 }
0x16fc   :  { %3259 = vmatprep.mubr.msk.bf16.mxu0 %vm3517_vm1, %v3516_v16 }
0x16ff   :  { %3254 = vmatmul.mubr.msk.bf16.vlgmr.msra.gmra.mrb[56].mxu1 %vm198_vm2, %v1999_v53 }
0x1700   :  { %3265 = vmatprep.mubr.msk.bf16.mxu1 %vm3517_vm1, %v3516_v16 }
0x17c6   :  { %v4057_v54 = vpop.f32.mrb[56].mxu0 }
0x17c7   :  { %v3237_v55 = vpop.f32.mrb[57].mxu0 }
0x17c8   :  { %v1897_v56 = vpop.f32.mrb[58].mxu0 }
0x17c9   :  { %v3238_v57 = vpop.f32.mrb[59].mxu0 }
0x17ca   :  { %v4059_v58 = vpop.f32.mrb[52].mxu1 }
0x17cb   :  { %v3361_v40 = vpack.i.bf16 %v4059_v58, %v4057_v54  ;;  %v3243_v59 = vpop.f32.mrb[53].mxu1 }
0x17cc   :  { %v1945_v60 = vpop.f32.mrb[54].mxu1 }
0x17cd   :  { %v3244_v61 = vpop.f32.mrb[55].mxu1 }
0x17ce   :  { %v1992_v63 = vpop.f32.mrb[60].mxu0 }
0x17cf   :  { %v1993_v0 = vadd.f32 %v3970_v24, %v1992_v63  ;;  %v3249_v2 = vpop.f32.mrb[61].mxu0 }
0x17d0   :  { %v1995_v5 = vpop.f32.mrb[62].mxu0 }
0x17d1   :  { %v3250_v6 = vpop.f32.mrb[63].mxu0  ;;  %v2048_v7 = vsel %vm198_vm2, %v1993_v0, -inf }
0x17d2   :  { %v2042_v8 = vpop.f32.mrb[56].mxu1  ;;  %2049 = vmax.xlane.f32.xlu1 %v2048_v7 }
0x17d3   :  { %v2043_v9 = vadd.f32 %v3976_v28, %v2042_v8  ;;  %v3255_v10 = vpop.f32.mrb[57].mxu1 }
0x17d4   :  { %v2045_v12 = vpop.f32.mrb[58].mxu1 }
0x17d5   :  { %v3256_v13 = vpop.f32.mrb[59].mxu1  ;;  %v2051_v15 = vsel %vm198_vm2, %v2043_v9, -inf }
0x17d6   :  { %2052 = vmax.xlane.f32.xlu0 %v2051_v15 }
0x17e3   :  { %2072 = vrot.lane.b32.xlu1 %v3947_v11, %s4264_s28 }
0x17e7   :  { %2170 = vrot.lane.b32.xlu1 %v3947_v11, %s4265_s0 }
0x17eb   :  { %2220 = vrot.lane.b32.xlu1 %v3949_v14, %s4265_s0 }
0x17ef   :  { %2168 = vrot.lane.b32.xlu1 %v3947_v11, %s4266_s19 }
0x185f   :  { %v2050_v17 = vpop.xlane.xlu1 %2049 }
0x1860   :  { %v2054_v19 = vsub.f32 %v1993_v0, %v2050_v17 }
0x1862   :  { %v2056_v20 = vmul.f32 1.442695, %v2054_v19 }
0x1863   :  { %v2053_v21 = vpop.xlane.xlu0 %2052  ;;  %v2073_v25 = vpop.permute.xlu1 %2072 }
0x1864   :  { %3462 = vpow2.f32 %v2056_v20  ;;  %v2055_v27 = vsub.f32 %v2043_v9, %v2053_v21  ;;  %v2078_v30 = vsel %vm323_vm3, %v2073_v25, 0 }
0x1865   :  { %3258 = vmatpush3.bf16.msra.mxu0 %v2078_v30 }
0x1866   :  { %v2058_v26 = vmul.f32 1.442695, %v2055_v27  ;;  %3269 = vmatprep.subr.bf16.mxu0 %v3516_v16 }
0x1867   :  { %v2171_v50 = vpop.permute.xlu1 %2170 }
0x1868   :  { %3464 = vpow2.f32 %v2058_v26  ;;  %v2176_v45 = vsel %vm198_vm2, %v2171_v50, 0 }
0x186b   :  { %v2221_v43 = vpop.permute.xlu1 %2220 }
0x186c   :  { %v2226_v33 = vsel %vm198_vm2, %v2221_v43, 0 }
0x186e   :  { %v3463_v29 = vpop.eup %3462 }
0x186f   :  { %v2060_v31 = vsel %vm198_vm2, %v3463_v29, 0.0  ;;  %v2169_v47 = vpop.permute.xlu1 %2168 }
0x1870   :  { %2061 = vadd.xlane.f32.xlu0 %v2060_v31 }
0x1872   :  { %v3465_v34 = vpop.eup %3464 }
0x1873   :  { %v2063_v35 = vsel %vm198_vm2, %v3465_v34, 0.0 }
0x1874   :  { %2064 = vadd.xlane.f32.xlu0 %v2063_v35 }
0x188a   :  { %2120 = vrot.lane.b32.xlu0 %v3949_v14, %s4264_s28 }
0x188e   :  { %2218 = vrot.lane.b32.xlu0 %v3949_v14, %s4266_s19 }
0x18fd   :  { %v2062_v36 = vpop.xlane.xlu0 %2061 }
0x18fe   :  { %3466 = vrcp.f32 %v2062_v36  ;;  %v3388_v36 = vld [vmem:[%s4233_s6 + $0x10] sm:$0xff]  }
0x1901   :  { %v2065_v37 = vpop.xlane.xlu0 %2064 }
0x1902   :  { %3468 = vrcp.f32 %v2065_v37  ;;  %v3389_v37 = vld [vmem:[%s4233_s6 + $0x18] sm:$0xff]  }
0x1905   :  { %v2121_v38 = vpop.permute.xlu0 %2120 }
0x1906   :  { %v2126_v39 = vsel %vm323_vm3, %v2121_v38, 0 }
0x1907   :  { %3264 = vmatpush3.bf16.msra.mxu1 %v2126_v39 }
0x1908   :  { %v3467_v48 = vpop.eup %3466  ;;  %3275 = vmatprep.subr.bf16.mxu1 %v3516_v16 }
0x1909   :  { %v2068_v41 = vmul.f32 %v3467_v48, %v3463_v29  ;;  %v2219_v18 = vpop.permute.xlu0 %2218 }
0x190b   :  { %v2070_v42 = vpack.c.bf16 %v2068_v41, %v2068_v41 }
0x190c   :  { %v3469_v44 = vpop.eup %3468 }
0x190d   :  { %v2069_v46 = vmul.f32 %v3469_v44, %v3465_v34  ;;  %3260 = vmatmul.mubr.msk.bf16.vlgmr.msra.gmra.mrb[64].mxu0 %vm198_vm2, %v2070_v42 }
0x190e   :  { %3270 = vmatpush3.bf16.xpose.msra.mxu0 %v2176_v45  ;;  %3271 = vmatprep.mubr.msk.bf16.mxu0 %vm3517_vm1, %v3516_v16 }
0x190f   :  { %v2071_v32 = vpack.c.bf16 %v2069_v46, %v2069_v46  ;;  %3281 = vmatprep.subr.bf16.mxu0 %v3516_v16 }
0x1911   :  { %3266 = vmatmul.mubr.msk.bf16.vlgmr.msra.gmra.mrb[60].mxu1 %vm198_vm2, %v2071_v32 }
0x1912   :  { %3276 = vmatpush3.bf16.xpose.msra.mxu1 %v2226_v33  ;;  %3277 = vmatprep.mubr.msk.bf16.mxu1 %vm3517_vm1, %v3516_v16 }
0x1913   :  { %3287 = vmatprep.subr.bf16.mxu1 %v3516_v16 }
0x1915   :  { %3272 = vmatmul.mubr.msk.bf16.vlgmr.msra.gmra.mrb[68].mxu0 %vm198_vm2, %v2169_v47 }
0x1916   :  { %3283 = vmatprep.mubr.msk.bf16.mxu0 %vm3517_vm1, %v3516_v16 }
0x1919   :  { %3278 = vmatmul.mubr.msk.bf16.vlgmr.msra.gmra.mrb[64].mxu1 %vm198_vm2, %v2219_v18 }
0x191a   :  { %3289 = vmatprep.mubr.msk.bf16.mxu1 %vm3517_vm1, %v3516_v16 }
0x19e0   :  { %v2114_v22 = vpop.f32.mrb[64].mxu0 }
0x19e1   :  { %v3261_v23 = vpop.f32.mrb[65].mxu0 }
0x19e2   :  { %v2117_v49 = vpop.f32.mrb[66].mxu0 }
0x19e3   :  { %v3262_v51 = vpop.f32.mrb[67].mxu0 }
0x19e4   :  { %v2162_v52 = vpop.f32.mrb[60].mxu1 }
0x19e5   :  { %v3366_v53 = vpack.i.bf16 %v2162_v52, %v2114_v22  ;;  %v3267_v55 = vpop.f32.mrb[61].mxu1 }
0x19e6   :  { %v2165_v56 = vpop.f32.mrb[62].mxu1 }
0x19e7   :  { %v3268_v57 = vpop.f32.mrb[63].mxu1 }
0x19e8   :  { %v2212_v59 = vpop.f32.mrb[68].mxu0 }
0x19e9   :  { %v2213_v60 = vadd.f32 %v3970_v24, %v2212_v59  ;;  %v3273_v61 = vpop.f32.mrb[69].mxu0 }
0x19ea   :  { %v2215_v63 = vpop.f32.mrb[70].mxu0 }
0x19eb   :  { %v3274_v0 = vpop.f32.mrb[71].mxu0  ;;  %v2268_v2 = vsel %vm198_vm2, %v2213_v60, -inf }
0x19ec   :  { %v2262_v5 = vpop.f32.mrb[64].mxu1  ;;  %2269 = vmax.xlane.f32.xlu1 %v2268_v2 }
0x19ed   :  { %v2263_v6 = vadd.f32 %v3976_v28, %v2262_v5  ;;  %v3279_v7 = vpop.f32.mrb[65].mxu1 }
0x19ee   :  { %v2265_v8 = vpop.f32.mrb[66].mxu1 }
0x19ef   :  { %v3280_v9 = vpop.f32.mrb[67].mxu1  ;;  %v2271_v10 = vsel %vm198_vm2, %v2263_v6, -inf }
0x19f0   :  { %2272 = vmax.xlane.f32.xlu0 %v2271_v10 }
0x19fd   :  { %2292 = vrot.lane.b32.xlu1 %v3947_v11, %s4267_s1 }
0x1a01   :  { %3362 = vrot.lane.b32.xlu1 %v3361_v40, %s4268_s20 }
0x1a05   :  { %3367 = vrot.lane.b32.xlu1 %v3366_v53, %s4269_s21 }
0x1a79   :  { %v2270_v24 = vpop.xlane.xlu1 %2269 }
0x1a7a   :  { %v2274_v12 = vsub.f32 %v2213_v60, %v2270_v24 }
0x1a7c   :  { %v2276_v13 = vmul.f32 1.442695, %v2274_v12 }
0x1a7d   :  { %v2273_v28 = vpop.xlane.xlu0 %2272  ;;  %v2293_v15 = vpop.permute.xlu1 %2292 }
0x1a7e   :  { %3470 = vpow2.f32 %v2276_v13  ;;  %v2275_v17 = vsub.f32 %v2263_v6, %v2273_v28  ;;  %v2298_v19 = vsel %vm323_vm3, %v2293_v15, 0 }
0x1a7f   :  { %3282 = vmatpush3.bf16.msra.mxu0 %v2298_v19 }
0x1a80   :  { %v2278_v20 = vmul.f32 1.442695, %v2275_v17  ;;  %3293 = vmatprep.subr.bf16.mxu0 %v3516_v16 }
0x1a81   :  { %v3363_v43 = vpop.permute.xlu1 %3362 }
0x1a82   :  { %3472 = vpow2.f32 %v2278_v20  ;;  %v3365_v33 = vunpack.i.h.bf16 %v3363_v43  ;;  %v3364_v47 = vunpack.i.l.bf16 %v3363_v43 }
0x1a84   :  { %v2413_v49 = vsel %vm198_vm2, %v4017_v1, %v3365_v33  ;;  %v2412_v51 = vsel %vm198_vm2, %v4015_v62, %v3364_v47  ;;  %v2918_v62 = vld [vmem:[%s4234_s7 + $0x1] ss:$0 sm:$0xff] }
0x1a85   :  { %v3368_v32 = vpop.permute.xlu1 %3367 }
0x1a86   :  { %v3370_v18 = vunpack.i.h.bf16 %v3368_v32  ;;  %v3369_v22 = vunpack.i.l.bf16 %v3368_v32 }
0x1a88   :  { %v3471_v11 = vpop.eup %3470  ;;  %v2414_v55 = vsel %vm1101_vm4, %v2412_v51, %v3369_v22  ;;  %v2415_v56 = vsel %vm1101_vm4, %v2413_v49, %v3370_v18 }
0x1a89   :  { %v2280_v54 = vsel %vm198_vm2, %v3471_v11, 0.0 }
0x1a8a   :  { %2281 = vadd.xlane.f32.xlu0 %v2280_v54 }
0x1a8c   :  { %v3473_v58 = vpop.eup %3472 }
0x1a8d   :  { %v2283_v40 = vsel %vm198_vm2, %v3473_v58, 0.0 }
0x1a8e   :  { %2284 = vadd.xlane.f32.xlu0 %v2283_v40 }
0x1aa4   :  { %2340 = vrot.lane.b32.xlu0 %v3949_v14, %s4267_s1 }
0x1b17   :  { %v2282_v21 = vpop.xlane.xlu0 %2281 }
0x1b18   :  { %3474 = vrcp.f32 %v2282_v21 }
0x1b1b   :  { %v2285_v25 = vpop.xlane.xlu0 %2284 }
0x1b1c   :  { %3476 = vrcp.f32 %v2285_v25 }
0x1b1f   :  { %v2341_v27 = vpop.permute.xlu0 %2340 }
0x1b20   :  { %v2346_v30 = vsel %vm323_vm3, %v2341_v27, 0 }
0x1b21   :  { %3288 = vmatpush3.bf16.msra.mxu1 %v2346_v30 }
0x1b22   :  { %v3475_v26 = vpop.eup %3474  ;;  %3301 = vmatprep.subr.bf16.mxu1 %v3516_v16 }
0x1b23   :  { %v2288_v29 = vmul.f32 %v3475_v26, %v3471_v11  ;;  %v3391_v11 = vld [vmem:[%s4237_s10 + $0x18] sm:$0xff]  }
0x1b25   :  { %v2290_v31 = vpack.c.bf16 %v2288_v29, %v2288_v29  ;;  %v2924_v29 = vld [vmem:[%s4235_s8 + $0x1] ss:$0 sm:$0xff] }
0x1b26   :  { %v3477_v34 = vpop.eup %3476 }
0x1b27   :  { %v2289_v35 = vmul.f32 %v3477_v34, %v3473_v58  ;;  %3284 = vmatmul.mubr.msk.bf16.vlgmr.msra.gmra.mrb[72].mxu0 %vm198_vm2, %v2290_v31 }
0x1b28   :  { %3297 = vmatprep.mubr.msk.bf16.mxu0 %vm3517_vm1, %v3516_v16  ;;  %3294 = vmatpush3.bf16.msra.mxu0 %v3388_v36 }
0x1b29   :  { %v2291_v14 = vpack.c.bf16 %v2289_v35, %v2289_v35  ;;  %3295 = vmatprep.subr.bf16.mxu0 %v3516_v16 }
0x1b2b   :  { %3290 = vmatmul.mubr.msk.bf16.vlgmr.msra.gmra.mrb[68].mxu1 %vm198_vm2, %v2291_v14  ;;  %v2925_v14 = vld [vmem:[%s4236_s9 + $0x1] ss:$0 sm:$0xff] }
0x1b2c   :  { %3305 = vmatprep.mubr.msk.bf16.mxu1 %vm3517_vm1, %v3516_v16  ;;  %3296 = vmatpush3.bf16.msra.mxu0 %v3389_v37 }
0x1b2d   :  { %3309 = vmatprep.subr.bf16.mxu0 %v3516_v16 }
0x1bfa   :  { %v2334_v38 = vpop.f32.mrb[72].mxu0 }
0x1bfb   :  { %v3285_v39 = vpop.f32.mrb[73].mxu0 }
0x1bfc   :  { %v2337_v48 = vpop.f32.mrb[74].mxu0 }
0x1bfd   :  { %v3286_v50 = vpop.f32.mrb[75].mxu0  ;;  %v3392_v48 = vld [vmem:[%s4239_s12 + $0x20] sm:$0xff]  }
0x1bfe   :  { %v2382_v41 = vpop.f32.mrb[68].mxu1  ;;  %v3393_v50 = vld [vmem:[%s4239_s12 + $0x28] sm:$0xff]  }
0x1bff   :  { %v3371_v42 = vpack.i.bf16 %v2382_v41, %v2334_v38  ;;  %v3291_v44 = vpop.f32.mrb[69].mxu1  ;;  %v3394_v41 = vld [vmem:[%s4239_s12 + $0x30] sm:$0xff]  }
0x1c00   :  { %v2385_v45 = vpop.f32.mrb[70].mxu1  ;;  %v2931_v44 = vld [vmem:[%s4238_s11 + $0x1] ss:$0 sm:$0xff] }
0x1c01   :  { %v3292_v46 = vpop.f32.mrb[71].mxu1  ;;  %3372 = vrot.lane.b32.xlu1 %v3371_v42, %s4270_s4  ;;  %v3395_v42 = vld [vmem:[%s4239_s12 + $0x38] sm:$0xff]  }
0x1c73   :  { %v3373_v23 = vpop.permute.xlu1 %3372 }
0x1c74   :  { %v3375_v52 = vunpack.i.h.bf16 %v3373_v23  ;;  %v3374_v53 = vunpack.i.l.bf16 %v3373_v23 }
0x1c76   :  { %v2417_v57 = vsel %vm1104_vm5, %v2415_v56, %v3375_v52  ;;  %v2416_v59 = vsel %vm1104_vm5, %v2414_v55, %v3374_v53 }
0x1c77   :  { %v2418_v60 = vpack.c.bf16 %v2417_v57, %v2416_v59 }
0x1c79   :  { %3298 = vmatmul.mubr.msk.bf16.vlgmr.msra.gmra.mrb[76].mxu0 %vm69_vm0, %v2418_v60 }
0x1c7a   :  { %3317 = vmatprep.mubr.msk.bf16.mxu0 %vm3517_vm1, %v3516_v16  ;;  %3310 = vmatpush3.bf16.msra.mxu0 %v3392_v48 }
0x1c7b   :  { %3311 = vmatprep.subr.bf16.mxu0 %v3516_v16 }
0x1c7e   :  { %3312 = vmatpush3.bf16.msra.mxu0 %v3393_v50 }
0x1c7f   :  { %3313 = vmatprep.subr.bf16.mxu0 %v3516_v16 }
0x1c82   :  { %3314 = vmatpush3.bf16.msra.mxu0 %v3394_v41  ;;  %v2953_v41 = vld [vmem:[%s4242_s15 + $0x1] ss:$0 sm:$0xff] }
0x1c83   :  { %3315 = vmatprep.subr.bf16.mxu0 %v3516_v16 }
0x1c86   :  { %3316 = vmatpush3.bf16.msra.mxu0 %v3395_v42 }
0x1d4c   :  { %v2481_v1 = vpop.f32.mrb[76].mxu0 }
0x1d4d   :  { %v2482_v61 = vadd.f32 %v2918_v62, %v2481_v1  ;;  %v3299_v63 = vpop.f32.mrb[77].mxu0 }
0x1d4e   :  { %v2484_v0 = vpop.f32.mrb[78].mxu0 }
0x1d4f   :  { %v2485_v2 = vadd.f32 %v2918_v62, %v2484_v0  ;;  %v3300_v5 = vpop.f32.mrb[79].mxu0  ;;  %v2488_v6 = vadd.f32 %v2482_v61, %v3935_v3 }
0x1d51   :  { %v2494_v7 = vsel %vm69_vm0, %v2488_v6, 0.0  ;;  %v2489_v8 = vadd.f32 %v2485_v2, %v3937_v4  ;;  %v3390_v4 = vld [vmem:[%s4237_s10 + $0x10] sm:$0xff]  }
0x1d52   :  { %2495 = vadd.xlane.f32.xlu0 %v2494_v7  ;;  %3302 = vmatpush3.bf16.msra.mxu1 %v3390_v4 }
0x1d53   :  { %v2497_v9 = vsel %vm69_vm0, %v2489_v8, 0.0  ;;  %3303 = vmatprep.subr.bf16.mxu1 %v3516_v16 }
0x1d54   :  { %2498 = vadd.xlane.f32.xlu1 %v2497_v9 }
0x1d56   :  { %3304 = vmatpush3.bf16.msra.mxu1 %v3391_v11 }
0x1d57   :  { %3321 = vmatprep.subr.bf16.mxu1 %v3516_v16 }
0x1ddf   :  { %v2496_v10 = vpop.xlane.xlu0 %2495 }
0x1de0   :  { %v2500_v24 = vmul.f32 0.03125, %v2496_v10 }
0x1de1   :  { %v2499_v12 = vpop.xlane.xlu1 %2498 }
0x1de2   :  { %v2502_v13 = vsub.f32 %v2488_v6, %v2500_v24  ;;  %v2501_v28 = vmul.f32 0.03125, %v2499_v12  ;;  %v2944_v6 = vld [vmem:[%s4240_s13 + $0x1] ss:$0 sm:$0xff] }
0x1de4   :  { %v2503_v15 = vsub.f32 %v2489_v8, %v2501_v28  ;;  %v2504_v17 = vmul.f32 %v2502_v13, %v2502_v13 }
0x1de6   :  { %v2506_v19 = vsel %vm69_vm0, %v2504_v17, 0.0  ;;  %v2505_v20 = vmul.f32 %v2503_v15, %v2503_v15 }
0x1de7   :  { %2507 = vadd.xlane.f32.xlu0 %v2506_v19 }
0x1de8   :  { %v2509_v3 = vsel %vm69_vm0, %v2505_v20, 0.0 }
0x1deb   :  { %2510 = vadd.xlane.f32.xlu0 %v2509_v3 }
0x1e74   :  { %v2508_v54 = vpop.xlane.xlu0 %2507 }
0x1e75   :  { %v2512_v58 = vmul.f32 0.03125, %v2508_v54 }
0x1e77   :  { %v2514_v40 = vadd.f32 1e-12, %v2512_v58 }
0x1e78   :  { %v2511_v21 = vpop.xlane.xlu0 %2510 }
0x1e79   :  { %3478 = vrsqrt.f32 %v2514_v40  ;;  %v2513_v25 = vmul.f32 0.03125, %v2511_v21 }
0x1e7b   :  { %v2515_v27 = vadd.f32 1e-12, %v2513_v25 }
0x1e7d   :  { %3480 = vrsqrt.f32 %v2515_v27  ;;  %v3396_v27 = vld [vmem:[%s4243_s16] sm:$0xff]  }
0x1e83   :  { %v3479_v30 = vpop.eup %3478 }
0x1e84   :  { %v2518_v26 = vmul.f32 %v3479_v30, %v2502_v13  ;;  %v3397_v30 = vld [vmem:[%s4243_s16 + $0x8] sm:$0xff]  }
0x1e86   :  { %v2526_v34 = vmul.f32 %v2924_v29, %v2518_v26 }
0x1e87   :  { %v3481_v31 = vpop.eup %3480 }
0x1e88   :  { %v2519_v35 = vmul.f32 %v3481_v31, %v2503_v15  ;;  %v2534_v37 = vadd.f32 %v2925_v14, %v2526_v34 }
0x1e8a   :  { %v2527_v36 = vmul.f32 %v2924_v29, %v2519_v35 }
0x1e8c   :  { %v2535_v38 = vadd.f32 %v2925_v14, %v2527_v36 }
0x1e8e   :  { %v2536_v39 = vpack.c.bf16 %v2535_v38, %v2534_v37 }
0x1e90   :  { %3306 = vmatmul.mubr.msk.bf16.vlgmr.msra.gmra.mrb[72].mxu1 %vm69_vm0, %v2536_v39 }
0x1e91   :  { %3325 = vmatprep.mubr.msk.bf16.mxu1 %vm3517_vm1, %v3516_v16  ;;  %3322 = vmatpush3.bf16.msra.mxu1 %v3396_v27 }
0x1e92   :  { %3323 = vmatprep.subr.bf16.mxu1 %v3516_v16  ;;  %v2952_v16 = vld [vmem:[%s4241_s14 + $0x1] ss:$0 sm:$0xff]  ;;  %s3532_s14 = smov [#allocation2]  }
0x1e93   :  { %s2838_s5 = sshll.u32 %s3532_s14, 4  ;;  %s2839_s5 = int_to_ptr.vmem [resolvable:$true] %s2838_s5 }
0x1e94   :  { %s3492_s15 = scalar_lea.vmem %s2839_s5, 32  ;;  %p3497_p1 = scmp.lt.s32.totalorder %s2839_s5, %s2839_s5 }
0x1e95   :  { %3324 = vmatpush3.bf16.msra.mxu1 %v3397_v30  ;;  %p3493_p0 = scmp.ne.s32.totalorder %s2839_s5, %s3492_s15  ;;  %p3498_p2 = scmp.lt.s32.totalorder %s3492_s15, %s3492_s15 }
0x1e97   :  { %p3499_p3 = por %p3498_p2, %p3497_p1 }
0x1e99   :  { %p3500_p4 = pnand %p3499_p3, %p3493_p0 }
0x1f63   :  { %v2599_v45 = vpop.f32.mrb[72].mxu1 }
0x1f64   :  { %v2600_v46 = vadd.f32 %v2931_v44, %v2599_v45  ;;  %v3307_v43 = vpop.f32.mrb[73].mxu1 }
0x1f65   :  { %v2602_v32 = vpop.f32.mrb[74].mxu1 }
0x1f66   :  { %v2608_v33 = vmul.f32 0.044715, %v2600_v46  ;;  %v2603_v47 = vadd.f32 %v2931_v44, %v2602_v32  ;;  %v3308_v18 = vpop.f32.mrb[75].mxu1  ;;  %v2606_v1 = vmul.f32 0.5, %v2600_v46  ;;  %v2954_v32 = vld [vmem:[%s4244_s17] ss:$0 sm:$0xff] }
0x1f68   :  { %v2610_v22 = vmul.f32 %v2608_v33, %v2600_v46  ;;  %v2609_v23 = vmul.f32 0.044715, %v2603_v47  ;;  %v2607_v61 = vmul.f32 0.5, %v2603_v47 }
0x1f6a   :  { %v2612_v49 = vmul.f32 %v2610_v22, %v2600_v46  ;;  %v2611_v51 = vmul.f32 %v2609_v23, %v2603_v47 }
0x1f6c   :  { %v2614_v52 = vadd.f32 %v2612_v49, %v2600_v46  ;;  %v2613_v53 = vmul.f32 %v2611_v51, %v2603_v47 }
0x1f6e   :  { %v2616_v55 = vmul.f32 0.7978846, %v2614_v52  ;;  %v2615_v56 = vadd.f32 %v2613_v53, %v2603_v47 }
0x1f70   :  { %3482 = vtanh.f32 %v2616_v55  ;;  %v2617_v57 = vmul.f32 0.7978846, %v2615_v56 }
0x1f72   :  { %3484 = vtanh.f32 %v2617_v57 }
0x1f7a   :  { %v3483_v59 = vpop.eup %3482 }
0x1f7b   :  { %v2620_v60 = vadd.f32 1.0, %v3483_v59 }
0x1f7c   :  { %v3485_v62 = vpop.eup %3484 }
0x1f7d   :  { %v2621_v63 = vadd.f32 1.0, %v3485_v62  ;;  %v2622_v0 = vmul.f32 %v2620_v60, %v2606_v1 }
0x1f7f   :  { %v2623_v2 = vmul.f32 %v2621_v63, %v2607_v61 }
0x1f81   :  { %v2624_v5 = vpack.c.bf16 %v2623_v2, %v2622_v0 }
0x1f83   :  { %3318 = vmatmul.mubr.msk.bf16.vlgmr.msra.gmra.mrb[80].mxu0 %vm1347_vm6, %v2624_v5 }
0x2056   :  { %v2703_v7 = vpop.f32.mrb[80].mxu0 }
0x2057   :  { %v2704_v8 = vadd.f32 %v2944_v6, %v2703_v7  ;;  %v3319_v9 = vpop.f32.mrb[81].mxu0 }
0x2058   :  { %v2706_v10 = vpop.f32.mrb[82].mxu0 }
0x2059   :  { %v2710_v24 = vadd.f32 %v2704_v8, %v2534_v37  ;;  %v2707_v12 = vadd.f32 %v2944_v6, %v2706_v10  ;;  %v3320_v13 = vpop.f32.mrb[83].mxu0 }
0x205b   :  { %v2711_v28 = vadd.f32 %v2707_v12, %v2535_v38  ;;  %v2716_v15 = vsel %vm69_vm0, %v2710_v24, 0.0 }
0x205c   :  { %2717 = vadd.xlane.f32.xlu1 %v2716_v15 }
0x205d   :  { %v2719_v17 = vsel %vm69_vm0, %v2711_v28, 0.0 }
0x205e   :  { %2720 = vadd.xlane.f32.xlu0 %v2719_v17 }
0x20e9   :  { %v2718_v19 = vpop.xlane.xlu1 %2717 }
0x20ea   :  { %v2722_v20 = vmul.f32 0.03125, %v2718_v19 }
0x20eb   :  { %v2721_v3 = vpop.xlane.xlu0 %2720 }
0x20ec   :  { %v2724_v4 = vsub.f32 %v2710_v24, %v2722_v20  ;;  %v2723_v11 = vmul.f32 0.03125, %v2721_v3 }
0x20ee   :  { %v2725_v54 = vsub.f32 %v2711_v28, %v2723_v11  ;;  %v2726_v58 = vmul.f32 %v2724_v4, %v2724_v4 }
0x20f0   :  { %v2728_v40 = vsel %vm69_vm0, %v2726_v58, 0.0  ;;  %v2727_v21 = vmul.f32 %v2725_v54, %v2725_v54 }
0x20f1   :  { %2729 = vadd.xlane.f32.xlu1 %v2728_v40 }
0x20f2   :  { %v2731_v25 = vsel %vm69_vm0, %v2727_v21, 0.0 }
0x20f3   :  { %2732 = vadd.xlane.f32.xlu0 %v2731_v25 }
0x217e   :  { %v2730_v26 = vpop.xlane.xlu1 %2729 }
0x217f   :  { %v2734_v29 = vmul.f32 0.03125, %v2730_v26 }
0x2180   :  { %v2733_v31 = vpop.xlane.xlu0 %2732 }
0x2181   :  { %v2736_v34 = vadd.f32 1e-12, %v2734_v29  ;;  %v2735_v35 = vmul.f32 0.03125, %v2733_v31 }
0x2183   :  { %3486 = vrsqrt.f32 %v2736_v34  ;;  %v2737_v14 = vadd.f32 1e-12, %v2735_v35 }
0x2185   :  { %3488 = vrsqrt.f32 %v2737_v14 }
0x218d   :  { %v3487_v36 = vpop.eup %3486 }
0x218e   :  { %v2740_v37 = vmul.f32 %v3487_v36, %v2724_v4 }
0x218f   :  { %v3489_v38 = vpop.eup %3488 }
0x2190   :  { %v2741_v39 = vmul.f32 %v3489_v38, %v2725_v54  ;;  %v2748_v48 = vmul.f32 %v2952_v16, %v2740_v37 }
0x2192   :  { %v2749_v50 = vmul.f32 %v2952_v16, %v2741_v39  ;;  %v2756_v44 = vadd.f32 %v2953_v41, %v2748_v48 }
0x2194   :  { %v2757_v42 = vadd.f32 %v2953_v41, %v2749_v50 }
0x2196   :  { %v2759_v45 = vrot.slane %v2757_v42, 7 }
0x2198   :  { %v2762_v46 = vsel %vm2761_vm7, %v2756_v44, %v2759_v45 }
0x2199   :  { %v2763_v43 = vpack.c.bf16 %v2762_v46, %v2762_v46 }
0x219b   :  { %3326 = vmatmul.mubr.msk.bf16.vlgmr.msra.gmra.mrb[76].mxu1 %vm69_vm0, %v2763_v43 }
0x226e   :  { %v2824_v33 = vpop.f32.mrb[76].mxu1 }
0x226f   :  { %v2825_v47 = vadd.f32 %v2954_v32, %v2824_v33  ;;  %v3327_v18 = vpop.f32.mrb[77].mxu1 }
0x2270   :  { %v2827_v22 = vpop.f32.mrb[78].mxu1 }
0x2271   :  { %v3328_v23 = vpop.f32.mrb[79].mxu1  ;;  %2831 = vst.msk [vmem:[#allocation2] sm:$0x3] %vm2830_vm8, %v2825_v47 }
0x2272   :  { %3503 = shalt.err (!%p3500_p4)
}
0x2273   :  { %s3504_s17 = scalar_lea.hbm %s4245_s18, 32 }
0x2274   :  { %p3505_p5 = scmp.ne.s32.totalorder %s4245_s18, %s3504_s17  ;;  %p3508_p6 = scmp.lt.u32.totalorder %s3504_s17, %s4245_s18 }
0x2276   :  { %p3510_p7 = pnand %p3508_p6, %p3505_p5 }
0x2278   :  { %3513 = shalt.err (!%p3510_p7)
}
0x2279   :  { %2841 = dma.vmem_to_hbm [thread:$0]  %s2839_s5, 32, %s4245_s18, [#allocation3]  }
0x227a   :  { %3514 = dma.done.wait [#allocation3], 32  }
0x227b   :  { %3515 = vsyncadd [#allocation3], 4294967264 }
0x227c   :  { %2845 = vsyncpa [#allocation3], 1 }

</bundles_post_ra>
